<compile_context>
chip_gen: v5e
topology: v5e:2x2
jax: 0.10.0
libtpu: 0.0.40
codegen_flags: <defaults>
</compile_context>

<pallas_src>
import functools

import jax
import jax.numpy as jnp
from jax import lax
from jax.experimental import pallas as pl
from jax.experimental.pallas import tpu as pltpu

LN_EPS = 1e-5


# -----------------------------------------------------------------------------
# Helpers
# -----------------------------------------------------------------------------
def _vmem_budget_bytes():
    """Single source of truth for tile sizing and vmem_limit_bytes (~7/8 VMEM)."""
    try:
        cap = int(pltpu.get_tpu_info().vmem_capacity_bytes)
    except Exception:
        kind = jax.devices()[0].device_kind.lower()
        cap = (128 if ("v5" in kind or "v6" in kind) else 64) * 1024 * 1024
    return cap * 7 // 8


def _const_spec(shape, index_map):
    """Constant-index block: single-buffer it to halve its VMEM footprint."""
    try:
        return pl.BlockSpec(shape, index_map, pipeline_mode=pl.Buffered(1))
    except (TypeError, AttributeError):  # older jax without pipeline_mode
        return pl.BlockSpec(shape, index_map)


def _layernorm(x, w, b):
    # Two-pass (centered) variance: robust against mean >> spread.
    mu = jnp.mean(x, axis=-1, keepdims=True)
    xc = x - mu
    var = jnp.mean(xc * xc, axis=-1, keepdims=True)
    return xc * lax.rsqrt(var + LN_EPS) * w + b


def _pick_tile_v(V, D, rows, vmem_bytes):
    """Vocab tile sized against actual VMEM; keep >=2 tiles for v7x dual-TC."""
    budget = max(vmem_bytes // 3, 1 << 20)
    tile = 128
    for cand in (256, 512, 1024, 2048):
        need = 2 * cand * D * 2 + 2 * rows * cand * 2 + rows * D * 2
        if need <= budget:
            tile = cand
    while tile > 128 and pl.cdiv(V, tile) < 2:
        tile //= 2
    return tile


# -----------------------------------------------------------------------------
# Pallas kernels
# -----------------------------------------------------------------------------
def blocks_kernel(x_ref, csf_ref, csi_ref, gr_ref, gi_ref,
                  ln1w_ref, ln1b_ref, ln2w_ref, ln2b_ref,
                  w1_ref, b1_ref, w2_ref, b2_ref,
                  lnfw_ref, lnfb_ref, xn_ref, xs_ref, *, batch, seq):
    """All SPECTRE blocks; grid axis = layer ("arbitrary"), activation resident.

    x_ref : (B*L, D) f32   token rows (read at layer 0 only)
    csf   : (2L, L) bf16   stacked forward DFT [[C], [-S]]
    csi   : (L, 2L) bf16   stacked inverse DFT [C, -S] / L
    gr/gi : (L, D)  f32    complex gates (stored once, no duplication)
    xn_ref: (B*L, D) bf16  final-LN'd activation (written at last layer)
    xs_ref: (B*L, D) f32   VMEM-resident activation across layers
    """
    layer = pl.program_id(0)
    L = seq

    @pl.when(layer == 0)
    def _():
        xs_ref[...] = x_ref[...]

    # ---- spectral token mixing (pre-LN), independent per batch element ----
    csf = csf_ref[...]
    csi = csi_ref[...]
    gr = gr_ref[...]
    gi = gi_ref[...]
    ln1w = ln1w_ref[...]
    ln1b = ln1b_ref[...]
    for b in range(batch):  # static unroll; B is small
        xb = xs_ref[pl.ds(b * L, L), :]                       # (L, D) f32
        h = _layernorm(xb, ln1w, ln1b)
        # forward DFT, one MXU launch: fx = [Xr; Xi]  (2L, D), f32 accumulation
        fx = jnp.dot(csf, h.astype(jnp.bfloat16),
                     preferred_element_type=jnp.float32)
        xr = fx[:L]
        xi = fx[L:]
        # complex gating on the two sublane-aligned halves (VPU, no roll)
        yr = gr * xr - gi * xi
        yi = gr * xi + gi * xr
        y = jnp.concatenate([yr, yi], axis=0).astype(jnp.bfloat16)   # (2L, D)
        # inverse DFT real part, one MXU launch (1/L folded into csi)
        mixed = jnp.dot(csi, y, preferred_element_type=jnp.float32)  # (L, D)
        xs_ref[pl.ds(b * L, L), :] = xb + mixed

    # ---- MLP (pre-LN) on flattened rows (B*L, D), bf16 MXU, f32 accumulation ----
    x_rows = xs_ref[...]
    h2 = _layernorm(x_rows, ln2w_ref[...], ln2b_ref[...])
    h2 = jnp.dot(h2.astype(jnp.bfloat16), w1_ref[...],
                 preferred_element_type=jnp.float32) + b1_ref[...]
    h2 = jax.nn.gelu(h2)
    h2 = jnp.dot(h2.astype(jnp.bfloat16), w2_ref[...],
                 preferred_element_type=jnp.float32) + b2_ref[...]
    xs_ref[...] = x_rows + h2

    # ---- final LayerNorm fused into the last layer; emit bf16 for the head ----
    @pl.when(layer == pl.num_programs(0) - 1)
    def _():
        xn_ref[...] = _layernorm(xs_ref[...], lnfw_ref[...],
                                 lnfb_ref[...]).astype(xn_ref.dtype)


def head_kernel(xn_ref, wt_ref, o_ref):
    """Tied LM head for one vocab tile: (rows, D)bf16 x (tile_v, D)bf16 -> logits."""
    logits = lax.dot_general(xn_ref[...], wt_ref[...],
                             dimension_numbers=(((1,), (1,)), ((), ())),
                             preferred_element_type=jnp.float32)
    o_ref[...] = logits.astype(o_ref.dtype)


# -----------------------------------------------------------------------------
# Wrappers
# -----------------------------------------------------------------------------
def run_blocks(x_rows, p, batch, seq):
    rows, D = x_rows.shape
    n_layers, _, H = p["w1"].shape
    L2 = 2 * seq
    vmem = _vmem_budget_bytes()

    def const(shape):
        n = len(shape)
        return _const_spec(shape, lambda l, n=n: (0,) * n)

    def per_layer(shape):
        n = len(shape)
        return pl.BlockSpec((None,) + shape, lambda l, n=n: (l,) + (0,) * n)

    return pl.pallas_call(
        functools.partial(blocks_kernel, batch=batch, seq=seq),
        out_shape=jax.ShapeDtypeStruct((rows, D), jnp.bfloat16),
        grid_spec=pltpu.PrefetchScalarGridSpec(
            num_scalar_prefetch=0,
            grid=(n_layers,),
            in_specs=[
                const((rows, D)),                       # x (DMA'd once)
                const((L2, seq)),                       # fwd DFT (bf16)
                const((seq, L2)),                       # inv DFT (bf16, 1/L folded)
                per_layer((seq, D)),                    # gate real
                per_layer((seq, D)),                    # gate imag
                per_layer((1, D)), per_layer((1, D)),   # ln1 w, b
                per_layer((1, D)), per_layer((1, D)),   # ln2 w, b
                per_layer((D, H)), per_layer((1, H)),   # W1 (bf16), b1
                per_layer((H, D)), per_layer((1, D)),   # W2 (bf16), b2
                const((1, D)), const((1, D)),           # ln_f w, b
            ],
            out_specs=pl.BlockSpec((rows, D), lambda l: (0, 0)),
            scratch_shapes=[pltpu.VMEM((rows, D), jnp.float32)],
        ),
        compiler_params=pltpu.CompilerParams(
            dimension_semantics=("arbitrary",),
            vmem_limit_bytes=vmem),
    )(x_rows, p["dft_fwd"], p["dft_inv"], p["gate_r"], p["gate_i"],
      p["ln1_w"], p["ln1_b"], p["ln2_w"], p["ln2_b"],
      p["w1"], p["b1"], p["w2"], p["b2"],
      p["ln_f_w"], p["ln_f_b"])


def run_head(xn_rows, embed_bf16):
    rows, D = xn_rows.shape
    V = embed_bf16.shape[0]
    vmem = _vmem_budget_bytes()
    tile_v = _pick_tile_v(V, D, rows, vmem)
    nv = pl.cdiv(V, tile_v)
    Vp = nv * tile_v
    if Vp != V:  # pad vocab so every tile is full; padded logits sliced off below
        embed_bf16 = jnp.pad(embed_bf16, ((0, Vp - V), (0, 0)))

    logits = pl.pallas_call(
        head_kernel,
        out_shape=jax.ShapeDtypeStruct((rows, Vp), jnp.bfloat16),
        grid_spec=pltpu.PrefetchScalarGridSpec(
            num_scalar_prefetch=0,
            grid=(nv,),                                        # vocab streamed once
            in_specs=[
                _const_spec((rows, D), lambda v: (0, 0)),      # xn resident (bf16)
                pl.BlockSpec((tile_v, D), lambda v: (v, 0)),   # embed tile (bf16)
            ],
            out_specs=pl.BlockSpec((rows, tile_v), lambda v: (0, v)),
        ),
        compiler_params=pltpu.CompilerParams(
            dimension_semantics=("parallel",),
            vmem_limit_bytes=vmem),
    )(xn_rows, embed_bf16)
    return logits[:, :V]


# -----------------------------------------------------------------------------
# Parameter construction (deterministic, synthetic) and reference
# -----------------------------------------------------------------------------
def trunc_normal(key, shape, std):
    return jax.random.truncated_normal(key, -2.0, 2.0, shape, jnp.float32) * std


def make_params(key, vocab_size, max_seq_len, d_model, n_layers, mlp_ratio, seq_len):
    hidden = mlp_ratio * d_model
    k = jax.random.split(key, 6)
    params = {}
    # Tied embed / LM-head weight stored once, in bf16 (MXU-native).
    params["embed"] = trunc_normal(k[0], (vocab_size, d_model), 0.02).astype(jnp.bfloat16)
    params["pos_embed"] = trunc_normal(k[1], (1, max_seq_len, d_model), 0.01)
    params["ln_f_w"] = jnp.ones((1, d_model), jnp.float32)
    params["ln_f_b"] = jnp.zeros((1, d_model), jnp.float32)

    # DFT matrices for seq_len L, stacked and pre-scaled (1/L folded into inverse).
    # TODO(synk): keep dft_inv (or both) in f32 at production L for spectral fidelity.
    t = jnp.arange(seq_len, dtype=jnp.float32)
    ang = 2.0 * jnp.pi * t[:, None] * t[None, :] / seq_len
    c, s = jnp.cos(ang), jnp.sin(ang)
    params["dft_fwd"] = jnp.concatenate([c, -s], axis=0).astype(jnp.bfloat16)              # (2L, L)
    params["dft_inv"] = (jnp.concatenate([c, -s], axis=1) / seq_len).astype(jnp.bfloat16)  # (L, 2L)

    kg = jax.random.split(k[2], 2)
    params["gate_r"] = 1.0 + 0.1 * trunc_normal(kg[0], (n_layers, seq_len, d_model), 1.0)
    params["gate_i"] = 0.1 * trunc_normal(kg[1], (n_layers, seq_len, d_model), 1.0)

    params["ln1_w"] = jnp.ones((n_layers, 1, d_model), jnp.float32)
    params["ln1_b"] = jnp.zeros((n_layers, 1, d_model), jnp.float32)
    params["ln2_w"] = jnp.ones((n_layers, 1, d_model), jnp.float32)
    params["ln2_b"] = jnp.zeros((n_layers, 1, d_model), jnp.float32)

    params["w1"] = trunc_normal(k[3], (n_layers, d_model, hidden), 0.02).astype(jnp.bfloat16)
    params["b1"] = jnp.zeros((n_layers, 1, hidden), jnp.float32)
    params["w2"] = trunc_normal(k[4], (n_layers, hidden, d_model), 0.02).astype(jnp.bfloat16)
    params["b2"] = jnp.zeros((n_layers, 1, d_model), jnp.float32)
    return params


@jax.jit
def spectre_lm_forward(idx, params):
    B, L = idx.shape
    D = params["embed"].shape[1]
    # embedding lookup + positional embedding (glue; gather stays in plain JAX)
    x = params["embed"][idx].astype(jnp.float32) + params["pos_embed"][:, :L]
    # dropout = identity (inference)
    x_rows = x.reshape(B * L, D)
    xn = run_blocks(x_rows, params, B, L)          # all layers + final LN, one call
    logits = run_head(xn, params["embed"])         # tied head, vocab streamed once
    return logits.reshape(B, L, -1)


def reference_forward(idx, p):
    """Pure-JAX mirror of the kernel math (same bf16 casts) for validation."""
    B, L = idx.shape
    n_layers = p["w1"].shape[0]
    x = p["embed"][idx].astype(jnp.float32) + p["pos_embed"][:, :L]
    csf, csi = p["dft_fwd"], p["dft_inv"]
    for l in range(n_layers):
        h = _layernorm(x, p["ln1_w"][l], p["ln1_b"][l])
        fx = jnp.einsum("fl,bld->bfd", csf, h.astype(jnp.bfloat16),
                        preferred_element_type=jnp.float32)
        xr, xi = fx[:, :L], fx[:, L:]
        gr, gi = p["gate_r"][l], p["gate_i"][l]
        y = jnp.concatenate([gr * xr - gi * xi, gr * xi + gi * xr], axis=1)
        mixed = jnp.einsum("lf,bfd->bld", csi, y.astype(jnp.bfloat16),
                           preferred_element_type=jnp.float32)
        x = x + mixed
        h2 = _layernorm(x, p["ln2_w"][l], p["ln2_b"][l])
        h2 = jnp.einsum("bld,dh->blh", h2.astype(jnp.bfloat16), p["w1"][l],
                        preferred_element_type=jnp.float32) + p["b1"][l]
        h2 = jax.nn.gelu(h2)
        h2 = jnp.einsum("blh,hd->bld", h2.astype(jnp.bfloat16), p["w2"][l],
                        preferred_element_type=jnp.float32) + p["b2"][l]
        x = x + h2
    xn = _layernorm(x, p["ln_f_w"], p["ln_f_b"]).astype(jnp.bfloat16)
    logits = jnp.einsum("bld,vd->blv", xn, p["embed"],
                        preferred_element_type=jnp.float32)
    return logits.astype(jnp.bfloat16)


# -----------------------------------------------------------------------------
if __name__ == "__main__":
    VOCAB = 256        # multiple of 128 → lane-dense head tiles
    MAX_SEQ = 16
    D_MODEL = 128      # lane-aligned
    N_LAYERS = 2
    MLP_RATIO = 4
    B, L = 2, 8        # rows = B*L = 16 → full bf16 (16,128) sublane tiles

    key = jax.random.PRNGKey(0)
    k_param, k_idx = jax.random.split(key)
    params = make_params(k_param, VOCAB, MAX_SEQ, D_MODEL, N_LAYERS, MLP_RATIO, L)
    idx = jax.random.randint(k_idx, (B, L), 0, VOCAB, dtype=jnp.int32)

    logits = spectre_lm_forward(idx, params)
    jax.block_until_ready(logits)
    assert logits.shape == (B, L, VOCAB), logits.shape
    assert bool(jnp.all(jnp.isfinite(logits.astype(jnp.float32))))

    # Validate against a pure-JAX reference (nonzero imaginary gates exercised).
    ref = reference_forward(idx, params)
    assert bool(jnp.allclose(logits.astype(jnp.float32), ref.astype(jnp.float32),
                             atol=2e-2, rtol=2e-2))
    print("KERNEL_OK")
</pallas_src>

<mosaic_0001>
module attributes {stable_mosaic.version = 11 : i64} {
  func.func @head_kernel(%arg0: i32, %arg1: memref<16x128xbf16, #tpu.memory_space<vmem>>, %arg2: memref<128x128xbf16, #tpu.memory_space<vmem>>, %arg3: memref<16x128xbf16, #tpu.memory_space<vmem>>) attributes {dimension_semantics = [#tpu.dimension_semantics<parallel>], iteration_bounds = array<i64: 2>, scalar_prefetch = 0 : i64, scratch_operands = 0 : i64, tpu.core_type = #tpu.core_type<tc>, window_params = [{pipeline_mode = #tpu.pipeline_mode<synchronous>, transform_indices = @transform_0, window_bounds = array<i64: 16, 128>}, {transform_indices = @transform_1, window_bounds = array<i64: 128, 128>}, {transform_indices = @transform_2, window_bounds = array<i64: 16, 128>}]} {
    %c0 = arith.constant 0 : index
    %c0_0 = arith.constant 0 : index
    %0 = vector.load %arg1[%c0, %c0_0] : memref<16x128xbf16, #tpu.memory_space<vmem>>, vector<16x128xbf16>
    %c0_1 = arith.constant 0 : index
    %c0_2 = arith.constant 0 : index
    %1 = vector.load %arg2[%c0_1, %c0_2] : memref<128x128xbf16, #tpu.memory_space<vmem>>, vector<128x128xbf16>
    %cst = arith.constant dense<0.000000e+00> : vector<16x128xf32>
    %2 = tpu.matmul %0, %1, %cst {dimension_numbers = #tpu.dot_dimension_numbers<[1], [1], [0], [0], [0, 0, 1, 0], [], []>} : vector<16x128xbf16>, vector<128x128xbf16>, vector<16x128xf32> -> vector<16x128xf32>
    %3 = arith.truncf %2 : vector<16x128xf32> to vector<16x128xbf16>
    %c0_3 = arith.constant 0 : index
    %c0_4 = arith.constant 0 : index
    %4 = vector.load %arg3[%c0_3, %c0_4] : memref<16x128xbf16, #tpu.memory_space<vmem>>, vector<16x128xbf16>
    tpu.vector_store %arg3[%c0_3, %c0_4], %3 {strides = array<i32>} : memref<16x128xbf16, #tpu.memory_space<vmem>>, vector<16x128xbf16>,
    return
  }
  func.func @transform_0(%arg0: i32) -> (i32, i32) {
    %c0_i32 = arith.constant 0 : i32
    %c0_i32_0 = arith.constant 0 : i32
    %c0_i32_1 = arith.constant 0 : i32
    return %c0_i32, %c0_i32_0 : i32, i32
  }
  func.func @transform_1(%arg0: i32) -> (i32, i32) {
    %c0_i32 = arith.constant 0 : i32
    %c0_i32_0 = arith.constant 0 : i32
    return %arg0, %c0_i32 : i32, i32
  }
  func.func @transform_2(%arg0: i32) -> (i32, i32) {
    %c0_i32 = arith.constant 0 : i32
    %c0_i32_0 = arith.constant 0 : i32
    return %c0_i32, %arg0 : i32, i32
  }
}

module attributes {stable_mosaic.version = 11 : i64} {
  func.func @blocks_kernel(%arg0: i32, %arg1: memref<16x128xf32, #tpu.memory_space<vmem>>, %arg2: memref<16x8xbf16, #tpu.memory_space<vmem>>, %arg3: memref<8x16xbf16, #tpu.memory_space<vmem>>, %arg4: memref<1x8x128xf32, #tpu.memory_space<vmem>>, %arg5: memref<1x8x128xf32, #tpu.memory_space<vmem>>, %arg6: memref<1x1x128xf32, #tpu.memory_space<vmem>>, %arg7: memref<1x1x128xf32, #tpu.memory_space<vmem>>, %arg8: memref<1x1x128xf32, #tpu.memory_space<vmem>>, %arg9: memref<1x1x128xf32, #tpu.memory_space<vmem>>, %arg10: memref<1x128x512xbf16, #tpu.memory_space<vmem>>, %arg11: memref<1x1x512xf32, #tpu.memory_space<vmem>>, %arg12: memref<1x512x128xbf16, #tpu.memory_space<vmem>>, %arg13: memref<1x1x128xf32, #tpu.memory_space<vmem>>, %arg14: memref<1x128xf32, #tpu.memory_space<vmem>>, %arg15: memref<1x128xf32, #tpu.memory_space<vmem>>, %arg16: memref<16x128xbf16, #tpu.memory_space<vmem>>, %arg17: memref<16x128xf32, #tpu.memory_space<vmem>>) attributes {dimension_semantics = [#tpu.dimension_semantics<arbitrary>], iteration_bounds = array<i64: 2>, scalar_prefetch = 0 : i64, scratch_operands = 1 : i64, tpu.core_type = #tpu.core_type<tc>, window_params = [{pipeline_mode = #tpu.pipeline_mode<synchronous>, transform_indices = @transform_0, window_bounds = array<i64: 16, 128>}, {pipeline_mode = #tpu.pipeline_mode<synchronous>, transform_indices = @transform_1, window_bounds = array<i64: 16, 8>}, {pipeline_mode = #tpu.pipeline_mode<synchronous>, transform_indices = @transform_2, window_bounds = array<i64: 8, 16>}, {transform_indices = @transform_3, window_bounds = array<i64: 1, 8, 128>}, {transform_indices = @transform_4, window_bounds = array<i64: 1, 8, 128>}, {transform_indices = @transform_5, window_bounds = array<i64: 1, 1, 128>}, {transform_indices = @transform_6, window_bounds = array<i64: 1, 1, 128>}, {transform_indices = @transform_7, window_bounds = array<i64: 1, 1, 128>}, {transform_indices = @transform_8, window_bounds = array<i64: 1, 1, 128>}, {transform_indices = @transform_9, window_bounds = array<i64: 1, 128, 512>}, {transform_indices = @transform_10, window_bounds = array<i64: 1, 1, 512>}, {transform_indices = @transform_11, window_bounds = array<i64: 1, 512, 128>}, {transform_indices = @transform_12, window_bounds = array<i64: 1, 1, 128>}, {pipeline_mode = #tpu.pipeline_mode<synchronous>, transform_indices = @transform_13, window_bounds = array<i64: 1, 128>}, {pipeline_mode = #tpu.pipeline_mode<synchronous>, transform_indices = @transform_14, window_bounds = array<i64: 1, 128>}, {pipeline_mode = #tpu.pipeline_mode<synchronous>, transform_indices = @transform_15, window_bounds = array<i64: 16, 128>}]} {
    %c0_i32 = arith.constant 0 : i32
    %0 = arith.cmpi eq, %arg0, %c0_i32 : i32
    %1 = arith.extui %0 : i1 to i32
    %c0_i32_0 = arith.constant 0 : i32
    %2 = arith.cmpi ne, %1, %c0_i32_0 : i32
    scf.if %2 {
      %c0_70 = arith.constant 0 : index
      %c0_71 = arith.constant 0 : index
      %144 = vector.load %arg1[%c0_70, %c0_71] : memref<16x128xf32, #tpu.memory_space<vmem>>, vector<16x128xf32>
      %c0_72 = arith.constant 0 : index
      %c0_73 = arith.constant 0 : index
      %145 = vector.load %arg17[%c0_72, %c0_73] : memref<16x128xf32, #tpu.memory_space<vmem>>, vector<16x128xf32>
      tpu.vector_store %arg17[%c0_72, %c0_73], %144 {strides = array<i32>} : memref<16x128xf32, #tpu.memory_space<vmem>>, vector<16x128xf32>,
    } else {
    }
    %c0 = arith.constant 0 : index
    %c0_1 = arith.constant 0 : index
    %3 = vector.load %arg2[%c0, %c0_1] : memref<16x8xbf16, #tpu.memory_space<vmem>>, vector<16x8xbf16>
    %c0_2 = arith.constant 0 : index
    %c0_3 = arith.constant 0 : index
    %4 = vector.load %arg3[%c0_2, %c0_3] : memref<8x16xbf16, #tpu.memory_space<vmem>>, vector<8x16xbf16>
    %c0_4 = arith.constant 0 : index
    %c0_5 = arith.constant 0 : index
    %c0_6 = arith.constant 0 : index
    %5 = vector.load %arg4[%c0_4, %c0_5, %c0_6] : memref<1x8x128xf32, #tpu.memory_space<vmem>>, vector<1x8x128xf32>
    %6 = vector.shape_cast %5 : vector<1x8x128xf32> to vector<8x128xf32>
    %c0_7 = arith.constant 0 : index
    %c0_8 = arith.constant 0 : index
    %c0_9 = arith.constant 0 : index
    %7 = vector.load %arg5[%c0_7, %c0_8, %c0_9] : memref<1x8x128xf32, #tpu.memory_space<vmem>>, vector<1x8x128xf32>
    %8 = vector.shape_cast %7 : vector<1x8x128xf32> to vector<8x128xf32>
    %c0_10 = arith.constant 0 : index
    %c0_11 = arith.constant 0 : index
    %c0_12 = arith.constant 0 : index
    %9 = vector.load %arg6[%c0_10, %c0_11, %c0_12] : memref<1x1x128xf32, #tpu.memory_space<vmem>>, vector<1x1x128xf32>
    %10 = vector.shape_cast %9 : vector<1x1x128xf32> to vector<1x128xf32>
    %c0_13 = arith.constant 0 : index
    %c0_14 = arith.constant 0 : index
    %c0_15 = arith.constant 0 : index
    %11 = vector.load %arg7[%c0_13, %c0_14, %c0_15] : memref<1x1x128xf32, #tpu.memory_space<vmem>>, vector<1x1x128xf32>
    %12 = vector.shape_cast %11 : vector<1x1x128xf32> to vector<1x128xf32>
    %c0_16 = arith.constant 0 : index
    %c0_17 = arith.constant 0 : index
    %13 = vector.load %arg17[%c0_16, %c0_17] : memref<16x128xf32, #tpu.memory_space<vmem>>, vector<8x128xf32>
    %cst = arith.constant dense<0.000000e+00> : vector<8xf32>
    %14 = vector.multi_reduction <add>, %13, %cst [1] : vector<8x128xf32> to vector<8xf32>
    %15 = vector.shape_cast %14 : vector<8xf32> to vector<8x1xf32>
    %cst_18 = arith.constant 1.280000e+02 : f32
    %16 = vector.broadcast %cst_18 : f32 to vector<8x1xf32>
    %17 = arith.divf %15, %16 : vector<8x1xf32>
    %18 = vector.broadcast %17 : vector<8x1xf32> to vector<8x128xf32>
    %19 = arith.subf %13, %18 : vector<8x128xf32>
    %20 = arith.mulf %19, %19 : vector<8x128xf32>
    %cst_19 = arith.constant dense<0.000000e+00> : vector<8xf32>
    %21 = vector.multi_reduction <add>, %20, %cst_19 [1] : vector<8x128xf32> to vector<8xf32>
    %22 = vector.shape_cast %21 : vector<8xf32> to vector<8x1xf32>
    %cst_20 = arith.constant 1.280000e+02 : f32
    %23 = vector.broadcast %cst_20 : f32 to vector<8x1xf32>
    %24 = arith.divf %22, %23 : vector<8x1xf32>
    %cst_21 = arith.constant 9.99999974E-6 : f32
    %25 = vector.broadcast %cst_21 : f32 to vector<8x1xf32>
    %26 = arith.addf %24, %25 : vector<8x1xf32>
    %27 = math.rsqrt %26 : vector<8x1xf32>
    %28 = vector.broadcast %27 : vector<8x1xf32> to vector<8x128xf32>
    %29 = arith.mulf %19, %28 : vector<8x128xf32>
    %30 = vector.broadcast %10 : vector<1x128xf32> to vector<8x128xf32>
    %31 = arith.mulf %29, %30 : vector<8x128xf32>
    %32 = vector.broadcast %12 : vector<1x128xf32> to vector<8x128xf32>
    %33 = arith.addf %31, %32 : vector<8x128xf32>
    %34 = arith.truncf %33 : vector<8x128xf32> to vector<8x128xbf16>
    %cst_22 = arith.constant dense<0.000000e+00> : vector<16x128xf32>
    %35 = tpu.matmul %3, %34, %cst_22 {dimension_numbers = #tpu.dot_dimension_numbers<[1], [0], [0], [1], [0, 0, 1, 1], [], []>} : vector<16x8xbf16>, vector<8x128xbf16>, vector<16x128xf32> -> vector<16x128xf32>
    %36 = vector.extract_strided_slice %35 {offsets = [0, 0], sizes = [8, 128], strides = [1, 1]} : vector<16x128xf32> to vector<8x128xf32>
    %37 = vector.extract_strided_slice %35 {offsets = [8, 0], sizes = [8, 128], strides = [1, 1]} : vector<16x128xf32> to vector<8x128xf32>
    %38 = arith.mulf %6, %36 : vector<8x128xf32>
    %39 = arith.mulf %8, %37 : vector<8x128xf32>
    %40 = arith.subf %38, %39 : vector<8x128xf32>
    %41 = arith.mulf %6, %37 : vector<8x128xf32>
    %42 = arith.mulf %8, %36 : vector<8x128xf32>
    %43 = arith.addf %41, %42 : vector<8x128xf32>
    %44 = tpu.concatenate %40, %43 in 0 : vector<8x128xf32>, vector<8x128xf32> -> vector<16x128xf32>
    %45 = arith.truncf %44 : vector<16x128xf32> to vector<16x128xbf16>
    %cst_23 = arith.constant dense<0.000000e+00> : vector<8x128xf32>
    %46 = tpu.matmul %4, %45, %cst_23 {dimension_numbers = #tpu.dot_dimension_numbers<[1], [0], [0], [1], [0, 0, 1, 1], [], []>} : vector<8x16xbf16>, vector<16x128xbf16>, vector<8x128xf32> -> vector<8x128xf32>
    %47 = arith.addf %13, %46 : vector<8x128xf32>
    %c0_24 = arith.constant 0 : index
    %c0_25 = arith.constant 0 : index
    %48 = vector.load %arg17[%c0_24, %c0_25] : memref<16x128xf32, #tpu.memory_space<vmem>>, vector<8x128xf32>
    tpu.vector_store %arg17[%c0_24, %c0_25], %47 {strides = array<i32>} : memref<16x128xf32, #tpu.memory_space<vmem>>, vector<8x128xf32>,
    %c8 = arith.constant 8 : index
    %c0_26 = arith.constant 0 : index
    %49 = vector.load %arg17[%c8, %c0_26] : memref<16x128xf32, #tpu.memory_space<vmem>>, vector<8x128xf32>
    %cst_27 = arith.constant dense<0.000000e+00> : vector<8xf32>
    %50 = vector.multi_reduction <add>, %49, %cst_27 [1] : vector<8x128xf32> to vector<8xf32>
    %51 = vector.shape_cast %50 : vector<8xf32> to vector<8x1xf32>
    %cst_28 = arith.constant 1.280000e+02 : f32
    %52 = vector.broadcast %cst_28 : f32 to vector<8x1xf32>
    %53 = arith.divf %51, %52 : vector<8x1xf32>
    %54 = vector.broadcast %53 : vector<8x1xf32> to vector<8x128xf32>
    %55 = arith.subf %49, %54 : vector<8x128xf32>
    %56 = arith.mulf %55, %55 : vector<8x128xf32>
    %cst_29 = arith.constant dense<0.000000e+00> : vector<8xf32>
    %57 = vector.multi_reduction <add>, %56, %cst_29 [1] : vector<8x128xf32> to vector<8xf32>
    %58 = vector.shape_cast %57 : vector<8xf32> to vector<8x1xf32>
    %cst_30 = arith.constant 1.280000e+02 : f32
    %59 = vector.broadcast %cst_30 : f32 to vector<8x1xf32>
    %60 = arith.divf %58, %59 : vector<8x1xf32>
    %cst_31 = arith.constant 9.99999974E-6 : f32
    %61 = vector.broadcast %cst_31 : f32 to vector<8x1xf32>
    %62 = arith.addf %60, %61 : vector<8x1xf32>
    %63 = math.rsqrt %62 : vector<8x1xf32>
    %64 = vector.broadcast %63 : vector<8x1xf32> to vector<8x128xf32>
    %65 = arith.mulf %55, %64 : vector<8x128xf32>
    %66 = vector.broadcast %10 : vector<1x128xf32> to vector<8x128xf32>
    %67 = arith.mulf %65, %66 : vector<8x128xf32>
    %68 = vector.broadcast %12 : vector<1x128xf32> to vector<8x128xf32>
    %69 = arith.addf %67, %68 : vector<8x128xf32>
    %70 = arith.truncf %69 : vector<8x128xf32> to vector<8x128xbf16>
    %cst_32 = arith.constant dense<0.000000e+00> : vector<16x128xf32>
    %71 = tpu.matmul %3, %70, %cst_32 {dimension_numbers = #tpu.dot_dimension_numbers<[1], [0], [0], [1], [0, 0, 1, 1], [], []>} : vector<16x8xbf16>, vector<8x128xbf16>, vector<16x128xf32> -> vector<16x128xf32>
    %72 = vector.extract_strided_slice %71 {offsets = [0, 0], sizes = [8, 128], strides = [1, 1]} : vector<16x128xf32> to vector<8x128xf32>
    %73 = vector.extract_strided_slice %71 {offsets = [8, 0], sizes = [8, 128], strides = [1, 1]} : vector<16x128xf32> to vector<8x128xf32>
    %74 = arith.mulf %6, %72 : vector<8x128xf32>
    %75 = arith.mulf %8, %73 : vector<8x128xf32>
    %76 = arith.subf %74, %75 : vector<8x128xf32>
    %77 = arith.mulf %6, %73 : vector<8x128xf32>
    %78 = arith.mulf %8, %72 : vector<8x128xf32>
    %79 = arith.addf %77, %78 : vector<8x128xf32>
    %80 = tpu.concatenate %76, %79 in 0 : vector<8x128xf32>, vector<8x128xf32> -> vector<16x128xf32>
    %81 = arith.truncf %80 : vector<16x128xf32> to vector<16x128xbf16>
    %cst_33 = arith.constant dense<0.000000e+00> : vector<8x128xf32>
    %82 = tpu.matmul %4, %81, %cst_33 {dimension_numbers = #tpu.dot_dimension_numbers<[1], [0], [0], [1], [0, 0, 1, 1], [], []>} : vector<8x16xbf16>, vector<16x128xbf16>, vector<8x128xf32> -> vector<8x128xf32>
    %83 = arith.addf %49, %82 : vector<8x128xf32>
    %c8_34 = arith.constant 8 : index
    %c0_35 = arith.constant 0 : index
    %84 = vector.load %arg17[%c8_34, %c0_35] : memref<16x128xf32, #tpu.memory_space<vmem>>, vector<8x128xf32>
    tpu.vector_store %arg17[%c8_34, %c0_35], %83 {strides = array<i32>} : memref<16x128xf32, #tpu.memory_space<vmem>>, vector<8x128xf32>,
    %c0_36 = arith.constant 0 : index
    %c0_37 = arith.constant 0 : index
    %85 = vector.load %arg17[%c0_36, %c0_37] : memref<16x128xf32, #tpu.memory_space<vmem>>, vector<16x128xf32>
    %c0_38 = arith.constant 0 : index
    %c0_39 = arith.constant 0 : index
    %c0_40 = arith.constant 0 : index
    %86 = vector.load %arg8[%c0_38, %c0_39, %c0_40] : memref<1x1x128xf32, #tpu.memory_space<vmem>>, vector<1x1x128xf32>
    %87 = vector.shape_cast %86 : vector<1x1x128xf32> to vector<1x128xf32>
    %c0_41 = arith.constant 0 : index
    %c0_42 = arith.constant 0 : index
    %c0_43 = arith.constant 0 : index
    %88 = vector.load %arg9[%c0_41, %c0_42, %c0_43] : memref<1x1x128xf32, #tpu.memory_space<vmem>>, vector<1x1x128xf32>
    %89 = vector.shape_cast %88 : vector<1x1x128xf32> to vector<1x128xf32>
    %cst_44 = arith.constant dense<0.000000e+00> : vector<16xf32>
    %90 = vector.multi_reduction <add>, %85, %cst_44 [1] : vector<16x128xf32> to vector<16xf32>
    %91 = vector.shape_cast %90 : vector<16xf32> to vector<16x1xf32>
    %cst_45 = arith.constant 1.280000e+02 : f32
    %92 = vector.broadcast %cst_45 : f32 to vector<16x1xf32>
    %93 = arith.divf %91, %92 : vector<16x1xf32>
    %94 = vector.broadcast %93 : vector<16x1xf32> to vector<16x128xf32>
    %95 = arith.subf %85, %94 : vector<16x128xf32>
    %96 = arith.mulf %95, %95 : vector<16x128xf32>
    %cst_46 = arith.constant dense<0.000000e+00> : vector<16xf32>
    %97 = vector.multi_reduction <add>, %96, %cst_46 [1] : vector<16x128xf32> to vector<16xf32>
    %98 = vector.shape_cast %97 : vector<16xf32> to vector<16x1xf32>
    %cst_47 = arith.constant 1.280000e+02 : f32
    %99 = vector.broadcast %cst_47 : f32 to vector<16x1xf32>
    %100 = arith.divf %98, %99 : vector<16x1xf32>
    %cst_48 = arith.constant 9.99999974E-6 : f32
    %101 = vector.broadcast %cst_48 : f32 to vector<16x1xf32>
    %102 = arith.addf %100, %101 : vector<16x1xf32>
    %103 = math.rsqrt %102 : vector<16x1xf32>
    %104 = vector.broadcast %103 : vector<16x1xf32> to vector<16x128xf32>
    %105 = arith.mulf %95, %104 : vector<16x128xf32>
    %106 = vector.broadcast %87 : vector<1x128xf32> to vector<16x128xf32>
    %107 = arith.mulf %105, %106 : vector<16x128xf32>
    %108 = vector.broadcast %89 : vector<1x128xf32> to vector<16x128xf32>
    %109 = arith.addf %107, %108 : vector<16x128xf32>
    %110 = arith.truncf %109 : vector<16x128xf32> to vector<16x128xbf16>
    %c0_49 = arith.constant 0 : index
    %c0_50 = arith.constant 0 : index
    %c0_51 = arith.constant 0 : index
    %111 = vector.load %arg10[%c0_49, %c0_50, %c0_51] : memref<1x128x512xbf16, #tpu.memory_space<vmem>>, vector<1x128x512xbf16>
    %112 = vector.shape_cast %111 : vector<1x128x512xbf16> to vector<128x512xbf16>
    %cst_52 = arith.constant dense<0.000000e+00> : vector<16x512xf32>
    %113 = tpu.matmul %110, %112, %cst_52 {dimension_numbers = #tpu.dot_dimension_numbers<[1], [0], [0], [1], [0, 0, 1, 1], [], []>} : vector<16x128xbf16>, vector<128x512xbf16>, vector<16x512xf32> -> vector<16x512xf32>
    %c0_53 = arith.constant 0 : index
    %c0_54 = arith.constant 0 : index
    %c0_55 = arith.constant 0 : index
    %114 = vector.load %arg11[%c0_53, %c0_54, %c0_55] : memref<1x1x512xf32, #tpu.memory_space<vmem>>, vector<1x1x512xf32>
    %115 = vector.shape_cast %114 : vector<1x1x512xf32> to vector<1x512xf32>
    %116 = vector.broadcast %115 : vector<1x512xf32> to vector<16x512xf32>
    %117 = arith.addf %113, %116 : vector<16x512xf32>
    %118 = arith.mulf %117, %117 : vector<16x512xf32>
    %119 = arith.mulf %117, %118 : vector<16x512xf32>
    %cst_56 = arith.constant 4.471500e-02 : f32
    %120 = vector.broadcast %cst_56 : f32 to vector<16x512xf32>
    %121 = arith.mulf %120, %119 : vector<16x512xf32>
    %122 = arith.addf %117, %121 : vector<16x512xf32>
    %cst_57 = arith.constant 0.797884583 : f32
    %123 = vector.broadcast %cst_57 : f32 to vector<16x512xf32>
    %124 = arith.mulf %123, %122 : vector<16x512xf32>
    %125 = math.tanh %124 : vector<16x512xf32>
    %cst_58 = arith.constant 1.000000e+00 : f32
    %126 = vector.broadcast %cst_58 : f32 to vector<16x512xf32>
    %127 = arith.addf %126, %125 : vector<16x512xf32>
    %cst_59 = arith.constant 5.000000e-01 : f32
    %128 = vector.broadcast %cst_59 : f32 to vector<16x512xf32>
    %129 = arith.mulf %128, %127 : vector<16x512xf32>
    %130 = arith.mulf %117, %129 : vector<16x512xf32>
    %131 = arith.truncf %130 : vector<16x512xf32> to vector<16x512xbf16>
    %c0_60 = arith.constant 0 : index
    %c0_61 = arith.constant 0 : index
    %c0_62 = arith.constant 0 : index
    %132 = vector.load %arg12[%c0_60, %c0_61, %c0_62] : memref<1x512x128xbf16, #tpu.memory_space<vmem>>, vector<1x512x128xbf16>
    %133 = vector.shape_cast %132 : vector<1x512x128xbf16> to vector<512x128xbf16>
    %cst_63 = arith.constant dense<0.000000e+00> : vector<16x128xf32>
    %134 = tpu.matmul %131, %133, %cst_63 {dimension_numbers = #tpu.dot_dimension_numbers<[1], [0], [0], [1], [0, 0, 1, 1], [], []>} : vector<16x512xbf16>, vector<512x128xbf16>, vector<16x128xf32> -> vector<16x128xf32>
    %c0_64 = arith.constant 0 : index
    %c0_65 = arith.constant 0 : index
    %c0_66 = arith.constant 0 : index
    %135 = vector.load %arg13[%c0_64, %c0_65, %c0_66] : memref<1x1x128xf32, #tpu.memory_space<vmem>>, vector<1x1x128xf32>
    %136 = vector.shape_cast %135 : vector<1x1x128xf32> to vector<1x128xf32>
    %137 = vector.broadcast %136 : vector<1x128xf32> to vector<16x128xf32>
    %138 = arith.addf %134, %137 : vector<16x128xf32>
    %139 = arith.addf %85, %138 : vector<16x128xf32>
    %c0_67 = arith.constant 0 : index
    %c0_68 = arith.constant 0 : index
    %140 = vector.load %arg17[%c0_67, %c0_68] : memref<16x128xf32, #tpu.memory_space<vmem>>, vector<16x128xf32>
    tpu.vector_store %arg17[%c0_67, %c0_68], %139 {strides = array<i32>} : memref<16x128xf32, #tpu.memory_space<vmem>>, vector<16x128xf32>,
    %c1_i32 = arith.constant 1 : i32
    %141 = arith.cmpi eq, %arg0, %c1_i32 : i32
    %142 = arith.extui %141 : i1 to i32
    %c0_i32_69 = arith.constant 0 : i32
    %143 = arith.cmpi ne, %142, %c0_i32_69 : i32
    scf.if %143 {
      %c0_70 = arith.constant 0 : index
      %c0_71 = arith.constant 0 : index
      %144 = vector.load %arg17[%c0_70, %c0_71] : memref<16x128xf32, #tpu.memory_space<vmem>>, vector<16x128xf32>
      %c0_72 = arith.constant 0 : index
      %c0_73 = arith.constant 0 : index
      %145 = vector.load %arg14[%c0_72, %c0_73] : memref<1x128xf32, #tpu.memory_space<vmem>>, vector<1x128xf32>
      %c0_74 = arith.constant 0 : index
      %c0_75 = arith.constant 0 : index
      %146 = vector.load %arg15[%c0_74, %c0_75] : memref<1x128xf32, #tpu.memory_space<vmem>>, vector<1x128xf32>
      %cst_76 = arith.constant dense<0.000000e+00> : vector<16xf32>
      %147 = vector.multi_reduction <add>, %144, %cst_76 [1] : vector<16x128xf32> to vector<16xf32>
      %148 = vector.shape_cast %147 : vector<16xf32> to vector<16x1xf32>
      %cst_77 = arith.constant 1.280000e+02 : f32
      %149 = vector.broadcast %cst_77 : f32 to vector<16x1xf32>
      %150 = arith.divf %148, %149 : vector<16x1xf32>
      %151 = vector.broadcast %150 : vector<16x1xf32> to vector<16x128xf32>
      %152 = arith.subf %144, %151 : vector<16x128xf32>
      %153 = arith.mulf %152, %152 : vector<16x128xf32>
      %cst_78 = arith.constant dense<0.000000e+00> : vector<16xf32>
      %154 = vector.multi_reduction <add>, %153, %cst_78 [1] : vector<16x128xf32> to vector<16xf32>
      %155 = vector.shape_cast %154 : vector<16xf32> to vector<16x1xf32>
      %cst_79 = arith.constant 1.280000e+02 : f32
      %156 = vector.broadcast %cst_79 : f32 to vector<16x1xf32>
      %157 = arith.divf %155, %156 : vector<16x1xf32>
      %cst_80 = arith.constant 9.99999974E-6 : f32
      %158 = vector.broadcast %cst_80 : f32 to vector<16x1xf32>
      %159 = arith.addf %157, %158 : vector<16x1xf32>
      %160 = math.rsqrt %159 : vector<16x1xf32>
      %161 = vector.broadcast %160 : vector<16x1xf32> to vector<16x128xf32>
      %162 = arith.mulf %152, %161 : vector<16x128xf32>
      %163 = vector.broadcast %145 : vector<1x128xf32> to vector<16x128xf32>
      %164 = arith.mulf %162, %163 : vector<16x128xf32>
      %165 = vector.broadcast %146 : vector<1x128xf32> to vector<16x128xf32>
      %166 = arith.addf %164, %165 : vector<16x128xf32>
      %167 = arith.truncf %166 : vector<16x128xf32> to vector<16x128xbf16>
      %c0_81 = arith.constant 0 : index
      %c0_82 = arith.constant 0 : index
      %168 = vector.load %arg16[%c0_81, %c0_82] : memref<16x128xbf16, #tpu.memory_space<vmem>>, vector<16x128xbf16>
      tpu.vector_store %arg16[%c0_81, %c0_82], %167 {strides = array<i32>} : memref<16x128xbf16, #tpu.memory_space<vmem>>, vector<16x128xbf16>,
    } else {
    }
    return
  }
  func.func @transform_0(%arg0: i32) -> (i32, i32) {
    %c0_i32 = arith.constant 0 : i32
    %c0_i32_0 = arith.constant 0 : i32
    %c0_i32_1 = arith.constant 0 : i32
    return %c0_i32, %c0_i32_0 : i32, i32
  }
  func.func @transform_1(%arg0: i32) -> (i32, i32) {
    %c0_i32 = arith.constant 0 : i32
    %c0_i32_0 = arith.constant 0 : i32
    %c0_i32_1 = arith.constant 0 : i32
    return %c0_i32, %c0_i32_0 : i32, i32
  }
  func.func @transform_2(%arg0: i32) -> (i32, i32) {
    %c0_i32 = arith.constant 0 : i32
    %c0_i32_0 = arith.constant 0 : i32
    %c0_i32_1 = arith.constant 0 : i32
    return %c0_i32, %c0_i32_0 : i32, i32
  }
  func.func @transform_3(%arg0: i32) -> (i32, i32, i32) {
    %c0_i32 = arith.constant 0 : i32
    %c0_i32_0 = arith.constant 0 : i32
    %c0_i32_1 = arith.constant 0 : i32
    return %arg0, %c0_i32, %c0_i32_0 : i32, i32, i32
  }
  func.func @transform_4(%arg0: i32) -> (i32, i32, i32) {
    %c0_i32 = arith.constant 0 : i32
    %c0_i32_0 = arith.constant 0 : i32
    %c0_i32_1 = arith.constant 0 : i32
    return %arg0, %c0_i32, %c0_i32_0 : i32, i32, i32
  }
  func.func @transform_5(%arg0: i32) -> (i32, i32, i32) {
    %c0_i32 = arith.constant 0 : i32
    %c0_i32_0 = arith.constant 0 : i32
    %c0_i32_1 = arith.constant 0 : i32
    return %arg0, %c0_i32, %c0_i32_0 : i32, i32, i32
  }
  func.func @transform_6(%arg0: i32) -> (i32, i32, i32) {
    %c0_i32 = arith.constant 0 : i32
    %c0_i32_0 = arith.constant 0 : i32
    %c0_i32_1 = arith.constant 0 : i32
    return %arg0, %c0_i32, %c0_i32_0 : i32, i32, i32
  }
  func.func @transform_7(%arg0: i32) -> (i32, i32, i32) {
    %c0_i32 = arith.constant 0 : i32
    %c0_i32_0 = arith.constant 0 : i32
    %c0_i32_1 = arith.constant 0 : i32
    return %arg0, %c0_i32, %c0_i32_0 : i32, i32, i32
  }
  func.func @transform_8(%arg0: i32) -> (i32, i32, i32) {
    %c0_i32 = arith.constant 0 : i32
    %c0_i32_0 = arith.constant 0 : i32
    %c0_i32_1 = arith.constant 0 : i32
    return %arg0, %c0_i32, %c0_i32_0 : i32, i32, i32
  }
  func.func @transform_9(%arg0: i32) -> (i32, i32, i32) {
    %c0_i32 = arith.constant 0 : i32
    %c0_i32_0 = arith.constant 0 : i32
    %c0_i32_1 = arith.constant 0 : i32
    return %arg0, %c0_i32, %c0_i32_0 : i32, i32, i32
  }
  func.func @transform_10(%arg0: i32) -> (i32, i32, i32) {
    %c0_i32 = arith.constant 0 : i32
    %c0_i32_0 = arith.constant 0 : i32
    %c0_i32_1 = arith.constant 0 : i32
    return %arg0, %c0_i32, %c0_i32_0 : i32, i32, i32
  }
  func.func @transform_11(%arg0: i32) -> (i32, i32, i32) {
    %c0_i32 = arith.constant 0 : i32
    %c0_i32_0 = arith.constant 0 : i32
    %c0_i32_1 = arith.constant 0 : i32
    return %arg0, %c0_i32, %c0_i32_0 : i32, i32, i32
  }
  func.func @transform_12(%arg0: i32) -> (i32, i32, i32) {
    %c0_i32 = arith.constant 0 : i32
    %c0_i32_0 = arith.constant 0 : i32
    %c0_i32_1 = arith.constant 0 : i32
    return %arg0, %c0_i32, %c0_i32_0 : i32, i32, i32
  }
  func.func @transform_13(%arg0: i32) -> (i32, i32) {
    %c0_i32 = arith.constant 0 : i32
    %c0_i32_0 = arith.constant 0 : i32
    %c0_i32_1 = arith.constant 0 : i32
    return %c0_i32, %c0_i32_0 : i32, i32
  }
  func.func @transform_14(%arg0: i32) -> (i32, i32) {
    %c0_i32 = arith.constant 0 : i32
    %c0_i32_0 = arith.constant 0 : i32
    %c0_i32_1 = arith.constant 0 : i32
    return %c0_i32, %c0_i32_0 : i32, i32
  }
  func.func @transform_15(%arg0: i32) -> (i32, i32) {
    %c0_i32 = arith.constant 0 : i32
    %c0_i32_0 = arith.constant 0 : i32
    %c0_i32_1 = arith.constant 0 : i32
    return %c0_i32, %c0_i32_0 : i32, i32
  }
}

</mosaic_0001>

<bundles_post_ra>
// kernel: spectre_lm_forward.3
= control target key start
LH: loop header
LB: loop body
LE: loop exit
PB: predicated region body
PF: predicated region fallthrough
CT: control target
= control target key end

     0   :  { %7 = vsyncpa [#allocation3], 0  ;;  %s583_s0 = inlined_call_operand.vmem [shape: bf16[16,128], index: 0, kind: input, shape index: {}]   ;;  %s584_s1 = inlined_call_operand.vmem [shape: bf16[256,128], index: 1, kind: input, shape index: {}]   ;;  %s585_s2 = inlined_call_operand.hbm [shape: bf16[16,256], index: 2, kind: output, shape index: {}]  }
   0x1   :  { %9 = vsyncpa [#allocation3 + $0x1], 0  ;;  %s496_s9 = smov 0   ;;  %s498_s10 = smov 0  }
   0x2   :  { %s500_s11 = smov 0   ;;  %s502_s12 = smov 0  }
   0x3 LB: > { %s517_s13 = sadd.s32 4294967295, %s476_s12   ;;  %s311_s14 = sadd.s32 4294967294, %s476_s12   ;;  %s476_s12 = sphi %s502_s12, %s591_s12   ;;  %s472_s11 = sphi %s500_s11, %s590_s11   ;;  %s468_s10 = sphi %s498_s10, %s589_s10   ;;  %s464_s9 = sphi %s496_s9, %s588_s9  }
   0x4   : > { %s521_s15 = sadd.s32 1, %s476_s12   ;;  %s69_s16 = sadd.s32 1, %s472_s11 }
   0x5   : > { %s66_s17 = ssub.s32 %s476_s12, %s521_s15  ;;  %p79_p0 = scmp.ne.s32.totalorder %s472_s11, %s468_s10 }
   0x6   : > { %p67_p1 = scmp.eq.s32.totalorder %s66_s17, 0  ;;  %p80_p2 = scmp.eq.s32.totalorder %s517_s13, 1 }
   0x7   : > { %p85_p3 = scmp.ne.s32.totalorder %s468_s10, %s464_s9  ;;  %p86_p4 = scmp.eq.s32.totalorder %s311_s14, 1 }
   0x8   : > { %s532_s18 = scalar_select %p67_p1, %s472_s11, %s69_s16  }
   0x9   : > { %p534_p5 = por %p80_p2, %p79_p0  ;;  %p538_p6 = por %p86_p4, %p85_p3 }
   0xa   : > { %p314_p7 = scmp.ge.s32.totalorder %s476_s12, 1  ;;  %p116_p8 = scmp.lt.s32.totalorder %s476_s12, 3 }
   0xc   : > { %p117_p9 = pnand %p314_p7, %p116_p8 }
   0xd   : > { %s316_s21 = sshll.u32 (!%p117_p9), %s517_s13, 4  ;;  %s135_s28 = sand.u32 (!%p117_p9), 1, %s468_s10  }
   0xe   : > { %120 = sbr.rel (%p117_p9) target bundleno = 227 (0xe3), region = 28  ;;  %p139_p10 = scmp.lt.s32.totalorder (!%p117_p9), %s316_s21, 31 }
   0xf   : > { %s315_s29 = sshll.u32 (!%p117_p9), %s135_s28, 3  ;;  %s355_s30 = sshll.u32 (!%p117_p9), %s517_s13, 2 }
  0x10   : > { %s245_s5 = scalar_lea.hbm (!%p117_p9), %s585_s2, %s355_s30  ;;  %s137_s6 = scalar_lea.vmem (!%p117_p9), [#allocation2], %s315_s29 }
  0x11   : > { %s246_s7 = sshll.u32 (!%p117_p9), %s137_s6, 4  ;;  %s248_s8 = sshll.u32 (!%p117_p9), %s245_s5, 4  ;;  %s247_s7 = int_to_ptr.vmem [resolvable:$true] %s246_s7  ;;  %s249_s8 = int_to_ptr.hbm [resolvable:$true] %s248_s8 }
  0x12   : > { %s235_s14 = scalar_lea.sflag (!%p117_p9), [#allocation3], %s135_s28  ;;  %s428_s16 = sshra.s32 (!%p117_p9), %s249_s8, 4  ;;  %s429_s16 = int_to_ptr.hbm [resolvable:$true] %s428_s16 }
  0x13   : > { %s593_s21 = smov (!%p139_p10, %s316_s21), 31  ;;  %v358_v8 = vld [vmem:[%s583_s0] sm:$0xff]  ;;  %s430_s17 = scalar_lea.hbm %s429_s16, 8 }
  0x14   : > { %s317_s22 = sshll.u32 %s593_s21, 2  ;;  %p431_p11 = scmp.ne.s32.totalorder %s429_s16, %s430_s17 }
  0x15   : > { %s142_s25 = scalar_lea.vmem %s584_s1, %s317_s22  ;;  %s434_s22 = scalar_lea.hbm %s585_s2, 16 }
  0x16   : > { %v366_v0 = vld [vmem:[%s142_s25 + $0x38] sm:$0xff]  ;;  %v365_v1 = vld [vmem:[%s142_s25 + $0x30] sm:$0xff]  ;;  %v364_v2 = vld [vmem:[%s142_s25 + $0x28] sm:$0xff]  ;;  %p432_p12 = pnand %p431_p11, %p534_p5  ;;  %p435_p0 = scmp.lt.s32.totalorder %s429_s16, %s585_s2 }
  0x17   : > { %216 = vmatpush.bf16.xpose.msra.mxu0 %v366_v0  ;;  %v363_v3 = vld [vmem:[%s142_s25 + $0x20] sm:$0xff]  ;;  %v362_v4 = vld [vmem:[%s142_s25 + $0x18] sm:$0xff]  ;;  %v361_v5 = vld [vmem:[%s142_s25 + $0x10] sm:$0xff]  ;;  %p436_p1 = scmp.lt.s32.totalorder %s434_s22, %s430_s17 }
  0x18   : > { %v360_v6 = vld [vmem:[%s142_s25 + $0x8] sm:$0xff]  ;;  %v359_v7 = vld [vmem:[%s142_s25] sm:$0xff]  ;;  %p433_p13 = pneg %p432_p12 }
  0x19   : > { %p437_p2 = por %p436_p1, %p435_p0 }
  0x1b   : > { %p438_p3 = pnand %p437_p2, %p433_p13 }
  0x1f   : > { %217 = vmatpush.bf16.xpose.msra.mxu0 %v365_v1 }
  0x27   : > { %218 = vmatpush.bf16.xpose.msra.mxu0 %v364_v2 }
  0x2f   : > { %219 = vmatpush.bf16.xpose.msra.mxu0 %v363_v3 }
  0x37   : > { %220 = vmatpush.bf16.xpose.msra.mxu0 %v362_v4 }
  0x3f   : > { %221 = vmatpush.bf16.xpose.msra.mxu0 %v361_v5 }
  0x47   : > { %222 = vmatpush.bf16.xpose.msra.mxu0 %v360_v6 }
  0x4f   : > { %223 = vmatpush.bf16.xpose.msra.mxu0 %v359_v7 }
  0x56   : > { %224 = vmatmul.bf16.vlgmr.msra.gmra.mxu0 %v358_v8 }
  0xd3   : > { %v225_v9 = vpop.f32.mrf.mxu0 }
  0xdb   : > { %v227_v10 = vpop.f32.mrf.mxu0 }
  0xdc   : > { %v370_v11 = vpack.c.bf16 %v227_v10, %v225_v9 }
  0xde   : > { %371 = vst [vmem:[%s137_s6] sm:$0xff] %v370_v11  }
  0xdf   : > { %441 = shalt.err (!%p438_p3)
}
  0xe0   : > { %s478_s25 = smov 64   ;;  %s479_s26 = smov 128  }
  0xe1   : > { %s480_s27 = smov 4  }
  0xe2   : > { %372 = dma.vmem_to_hbm [thread:$0]  (%p534_p5), %s247_s7, 128, %s249_s8, %s235_s14, %s478_s25, %s479_s26, %s480_s27  }
  0xe3 PF: > { %p378_p4 = scmp.ge.s32.totalorder %s476_s12, 2  ;;  %s263_s28 = sand.u32 1, %s464_s9  }
  0xe4   : > { %s264_s29 = scalar_lea.sflag [#allocation3], %s263_s28 }
  0xe5   : > { %p375_p7 = pnand %p378_p4, %p538_p6 }
  0xe7   : > { %p376_p8 = pneg %p375_p7 }
  0xe9   : > { %459 = dma.done.wait (%p376_p8), %s264_s29, 128  }
  0xea   : > { %461 = vsyncadd (%p376_p8), %s264_s29, 4294967168  ;;  %p12_p9 = scmp.ge.s32.totalorder %s521_s15, 4   ;;  %s588_s9 = smov %s468_s10 }
  0xeb   : > { %s589_s10 = smov %s472_s11  ;;  %s590_s11 = smov %s532_s18 }
  0xec   : > { %s591_s12 = smov %s521_s15  ;;  %14 = sbr.rel (!%p12_p9) target bundleno = 3 (0x3), region = 63 }
  0xf1   :  { %270 = vsyncpa [#allocation3], 1 }
  0xf2   :  { %272 = vsyncpa [#allocation3 + $0x1], 1 }

// kernel: spectre_lm_forward.2
= control target key start
LH: loop header
LB: loop body
LE: loop exit
PB: predicated region body
PF: predicated region fallthrough
CT: control target
= control target key end

     0   :  { %s3269_s0 = inlined_call_operand.vmem [shape: f32[16,128], index: 0, kind: input, shape index: {}]   ;;  %s3270_s1 = inlined_call_operand.vmem [shape: bf16[16,8], index: 1, kind: input, shape index: {}]   ;;  %s3271_s2 = inlined_call_operand.vmem [shape: bf16[8,16], index: 2, kind: input, shape index: {}]   ;;  %s3272_s3 = inlined_call_operand.vmem [shape: f32[2,8,128], index: 3, kind: input, shape index: {}]   ;;  %s3273_s4 = inlined_call_operand.hbm [shape: f32[2,8,128], index: 4, kind: input, shape index: {}]   ;;  %s3274_s5 = inlined_call_operand.vmem [shape: f32[2,1,128], index: 5, kind: input, shape index: {}]   ;;  %s3275_s6 = inlined_call_operand.hbm [shape: f32[2,1,128], index: 6, kind: input, shape index: {}]   ;;  %s3276_s7 = inlined_call_operand.hbm [shape: f32[2,1,128], index: 7, kind: input, shape index: {}]   ;;  %s3277_s8 = inlined_call_operand.hbm [shape: f32[2,1,128], index: 8, kind: input, shape index: {}]   ;;  %s3278_s9 = inlined_call_operand.hbm [shape: bf16[2,128,512], index: 9, kind: input, shape index: {}]   ;;  %s3279_s10 = inlined_call_operand.vmem [shape: f32[2,1,512], index: 10, kind: input, shape index: {}]   ;;  %s3280_s11 = inlined_call_operand.hbm [shape: bf16[2,512,128], index: 11, kind: input, shape index: {}]   ;;  %s3281_s12 = inlined_call_operand.hbm [shape: f32[2,1,128], index: 12, kind: input, shape index: {}]   ;;  %s3282_s13 = inlined_call_operand.vmem [shape: f32[1,128], index: 13, kind: input, shape index: {}]   ;;  %s3283_s14 = inlined_call_operand.hbm [shape: f32[1,128], index: 14, kind: input, shape index: {}]   ;;  %s3284_s15 = inlined_call_operand.vmem [shape: bf16[16,128], index: 15, kind: output, shape index: {}]  }
   0x1   :  { %3292 = sst [smem:[#allocation24_spill]] %s3269_s0 }
   0x2   :  { %3293 = sst [smem:[#allocation25_spill]] %s3270_s1 }
   0x3   :  { %3294 = sst [smem:[#allocation26_spill]] %s3271_s2 }
   0x4   :  { %3295 = sst [smem:[#allocation27_spill]] %s3272_s3 }
   0x5   :  { %3296 = sst [smem:[#allocation28_spill]] %s3274_s5 }
   0x6   :  { %3297 = sst [smem:[#allocation29_spill]] %s3275_s6 }
   0x7   :  { %3298 = sst [smem:[#allocation30_spill]] %s3277_s8 }
   0x8   :  { %3299 = sst [smem:[#allocation31_spill]] %s3279_s10 }
   0x9   :  { %3300 = sst [smem:[#allocation32_spill]] %s3280_s11 }
   0xa   :  { %3301 = sst [smem:[#allocation33_spill]] %s3282_s13 }
   0xb   :  { %3302 = sst [smem:[#allocation34_spill]] %s3283_s14 }
   0xc   :  { %3303 = sst [smem:[#allocation35_spill]] %s3284_s15 }
   0xd   :  { %20 = vsyncpa [#allocation4], 0 }
   0xe   :  { %22 = vsyncpa [#allocation4 + $0x1], 0 }
   0xf   :  { %23 = vsyncpa [#allocation6], 0 }
  0x10   :  { %25 = vsyncpa [#allocation6 + $0x1], 0 }
  0x11   :  { %26 = vsyncpa [#allocation9], 0 }
  0x12   :  { %28 = vsyncpa [#allocation9 + $0x1], 0 }
  0x13   :  { %29 = vsyncpa [#allocation12], 0 }
  0x14   :  { %31 = vsyncpa [#allocation12 + $0x1], 0 }
  0x15   :  { %32 = vsyncpa [#allocation15], 0  ;;  %s2771_s18 = smov 0   ;;  %s2773_s19 = smov 0  }
  0x16   :  { %s2775_s20 = smov 0   ;;  %s2777_s21 = smov 0  }
  0x17 LB: > { %3304 = sst [smem:[#allocation21_spill]] %s2679_s20  ;;  %s2792_s22 = sadd.s32 1, %s2683_s21   ;;  %s2683_s21 = sphi %s2777_s21, %s3328_s21   ;;  %s2679_s20 = sphi %s2775_s20, %s3330_s20   ;;  %s2675_s19 = sphi %s2773_s19, %s3332_s19   ;;  %s2671_s18 = sphi %s2771_s18, %s3331_s18  }
  0x18   : > { %3305 = sst [smem:[#allocation22_spill]] %s2792_s22  ;;  %s134_s23 = sadd.s32 1, %s2679_s20 }
  0x19   : > { %s131_s24 = ssub.s32 %s2683_s21, %s2792_s22  ;;  %p141_p0 = scmp.ne.s32.totalorder %s2679_s20, %s2675_s19 }
  0x1a   : > { %p132_p1 = scmp.eq.s32.totalorder %s131_s24, 0  ;;  %p142_p2 = scmp.eq.s32.totalorder %s2683_s21, 0 }
  0x1b   : > { %p2316_p3 = scmp.lt.s32.totalorder %s2683_s21, 2  ;;  %s2805_s26 = sand.u32 1, %s2679_s20  }
  0x1c   : > { %s2802_s25 = scalar_select %p132_p1, %s2679_s20, %s134_s23  }
  0x1d   : > { %p143_p4 = por %p142_p2, %p141_p0  ;;  %s2808_s27 = sand.u32 1, %s2683_s21  }
  0x1e   : > { %3306 = sst [smem:[#allocation23_spill]] %s2802_s25  ;;  %s501_s17 = scalar_lea.vmem [#allocation5], %s2805_s26 }
  0x1f   : > { %p2810_p5 = pnand %p2316_p3, %p143_p4  ;;  %s3308_s6 = sld [smem:[#allocation29_spill]] }
  0x20   : > { %s508_s24 = sshll.u32 %s501_s17, 4  ;;  %s3289_s25 = scalar_lea.sflag [#allocation6], %s2808_s27  ;;  %s509_s24 = int_to_ptr.vmem [resolvable:$true] %s508_s24 }
  0x21   : > { %p2822_p7 = pneg %p2810_p5 }
  0x25   : > { %s504_s16 = scalar_lea.hbm %s3308_s6, %s2683_s21 }
  0x26   : > { %s506_s23 = sshll.u32 %s504_s16, 4  ;;  %s2400_s16 = scalar_lea.hbm %s3308_s6, 2  ;;  %s507_s23 = int_to_ptr.hbm [resolvable:$true] %s506_s23 }
  0x27   : > { %s2393_s20 = sshra.s32 %s507_s23, 4  ;;  %s2394_s20 = int_to_ptr.hbm [resolvable:$true] %s2393_s20 }
  0x28   : > { %s2395_s22 = scalar_lea.hbm %s2394_s20, 1  ;;  %p2401_p10 = scmp.lt.s32.totalorder %s2394_s20, %s3308_s6 }
  0x29   : > { %p2396_p6 = scmp.ne.s32.totalorder %s2394_s20, %s2395_s22  ;;  %p2402_p11 = scmp.lt.s32.totalorder %s2400_s16, %s2395_s22 }
  0x2b   : > { %p2398_p8 = pnand %p2822_p7, %p2396_p6  ;;  %p2403_p12 = por %p2402_p11, %p2401_p10 }
  0x2d   : > { %p2399_p9 = pneg %p2398_p8 }
  0x2f   : > { %p2404_p13 = pnand %p2403_p12, %p2399_p9 }
  0x31   : > { %2407 = shalt.err (!%p2404_p13)
}
  0x32   : > { %2299 = dma.hbm_to_vmem [thread:$0]  (!%p2810_p5), %s507_s23, 16, %s509_s24, %s3289_s25  }
  0x33   : > { %s3310_s8 = sld [smem:[#allocation30_spill]]  ;;  %s535_s13 = scalar_lea.vmem [#allocation8], %s2805_s26 }
  0x34   : > { %s542_s20 = sshll.u32 %s535_s13, 4  ;;  %s3290_s22 = scalar_lea.sflag [#allocation9], %s2808_s27  ;;  %s543_s20 = int_to_ptr.vmem [resolvable:$true] %s542_s20 }
  0x39   : > { %s538_s30 = scalar_lea.hbm %s3310_s8, %s2683_s21  ;;  %s2430_s24 = scalar_lea.hbm %s3310_s8, 2 }
  0x3a   : > { %s540_s1 = sshll.u32 %s538_s30, 4  ;;  %s541_s1 = int_to_ptr.hbm [resolvable:$true] %s540_s1 }
  0x3b   : > { %s2423_s16 = sshra.s32 %s541_s1, 4  ;;  %s2424_s16 = int_to_ptr.hbm [resolvable:$true] %s2423_s16 }
  0x3c   : > { %s2425_s17 = scalar_lea.hbm %s2424_s16, 1  ;;  %p2431_p3 = scmp.lt.s32.totalorder %s2424_s16, %s3310_s8 }
  0x3d   : > { %p2426_p0 = scmp.ne.s32.totalorder %s2424_s16, %s2425_s17  ;;  %p2432_p4 = scmp.lt.s32.totalorder %s2430_s24, %s2425_s17 }
  0x3f   : > { %p2428_p1 = pnand %p2426_p0, %p2822_p7  ;;  %p2433_p6 = por %p2432_p4, %p2431_p3 }
  0x41   : > { %p2429_p2 = pneg %p2428_p1 }
  0x43   : > { %p2434_p8 = pnand %p2433_p6, %p2429_p2 }
  0x45   : > { %2437 = shalt.err (!%p2434_p8)
}
  0x46   : > { %2305 = dma.hbm_to_vmem [thread:$0]  (!%p2810_p5), %s541_s1, 16, %s543_s20, %s3290_s22  }
  0x47   : > { %s1918_s29 = sshll.u32 %s2805_s26, 8  ;;  %s2199_s30 = sshll.u32 %s2683_s21, 8 }
  0x48   : > { %s558_s13 = scalar_lea.hbm %s3278_s9, %s2199_s30  ;;  %s553_s16 = scalar_lea.vmem [#allocation10], %s1918_s29 }
  0x49   : > { %s559_s23 = sshll.u32 %s558_s13, 4  ;;  %s561_s17 = sshll.u32 %s553_s16, 4  ;;  %s2861_s23 = int_to_ptr.hbm [resolvable:$true] %s559_s23  ;;  %s2863_s17 = int_to_ptr.vmem [resolvable:$true] %s561_s17 }
  0x4a   : > { %s3311_s11 = sld [smem:[#allocation32_spill]]  ;;  %s582_s1 = scalar_lea.vmem [#allocation11], %s1918_s29 }
  0x4b   : > { %s590_s20 = sshll.u32 %s582_s1, 4  ;;  %s3291_s22 = scalar_lea.sflag [#allocation12], %s2808_s27  ;;  %s591_s20 = int_to_ptr.vmem [resolvable:$true] %s590_s20 }
  0x50   : > { %s587_s25 = scalar_lea.hbm %s3311_s11, %s2199_s30  ;;  %s2460_s10 = scalar_lea.hbm %s3311_s11, 512 }
  0x51   : > { %s588_s8 = sshll.u32 %s587_s25, 4  ;;  %s589_s8 = int_to_ptr.hbm [resolvable:$true] %s588_s8 }
  0x52   : > { %s2453_s0 = sshra.s32 %s589_s8, 4  ;;  %s2454_s0 = int_to_ptr.hbm [resolvable:$true] %s2453_s0 }
  0x53   : > { %s2455_s6 = scalar_lea.hbm %s2454_s0, 256  ;;  %p2461_p12 = scmp.lt.s32.totalorder %s2454_s0, %s3311_s11 }
  0x54   : > { %p2456_p9 = scmp.ne.s32.totalorder %s2454_s0, %s2455_s6  ;;  %p2462_p13 = scmp.lt.s32.totalorder %s2460_s10, %s2455_s6 }
  0x56   : > { %p2458_p10 = pnand %p2456_p9, %p2822_p7  ;;  %p2463_p0 = por %p2462_p13, %p2461_p12 }
  0x58   : > { %p2459_p11 = pneg %p2458_p10 }
  0x5a   : > { %p2464_p1 = pnand %p2463_p0, %p2459_p11 }
  0x5c   : > { %2467 = shalt.err (!%p2464_p1)
}
  0x5d   : > { %s2685_s25 = smov 64   ;;  %s2686_s29 = smov 4  }
  0x5e   : > { %2311 = dma.hbm_to_vmem [thread:$0]  (!%p2810_p5), %s589_s8, 4096, %s591_s20, %s3291_s22, %s2685_s25, %s2685_s25, %s2686_s29  }
  0x5f   : > { %s2882_s30 = sadd.s32 4294967295, %s2683_s21   ;;  %p147_p3 = scmp.ne.s32.totalorder %s2675_s19, %s2671_s18 }
  0x60   : > { %p148_p2 = scmp.eq.s32.totalorder %s2882_s30, 0  ;;  %p1913_p4 = scmp.ge.s32.totalorder %s2683_s21, 1 }
  0x61   : > { %p429_p6 = scmp.lt.s32.totalorder %s2683_s21, 3  ;;  %p1914_p8 = scmp.ne.s32.totalorder %s2882_s30, 0 }
  0x62   : > { %p2892_p9 = por %p148_p2, %p147_p3  ;;  %s3313_s14 = sld [smem:[#allocation34_spill]] }
  0x63   : > { %p2899_p10 = pnand %p1913_p4, %p429_p6  ;;  %s2687_s18 = smov [#allocation14]  }
  0x64   : > { %s455_s20 = sshll.u32 %s2687_s18, 4  ;;  %s1916_s0 = sshll.u32 %s2805_s26, 3  ;;  %s456_s20 = int_to_ptr.vmem [resolvable:$true] %s455_s20 }
  0x65   : > { %p2289_p11 = pneg %p2899_p10  ;;  %s1917_s6 = sshll.u32 %s2683_s21, 3 }
  0x66   : > { %s477_s13 = scalar_lea.vmem [#allocation3], %s1916_s0  ;;  %s481_s29 = scalar_lea.hbm %s3273_s4, %s1917_s6 }
  0x67   : > { %p2290_p12 = pnand %p2289_p11, %p148_p2  ;;  %s485_s16 = sshll.u32 %s477_s13, 4  ;;  %s486_s16 = int_to_ptr.vmem [resolvable:$true] %s485_s16 }
  0x68   : > { %s453_s8 = sshll.u32 %s3313_s14, 4  ;;  %s483_s10 = sshll.u32 %s481_s29, 4  ;;  %s454_s8 = int_to_ptr.hbm [resolvable:$true] %s453_s8  ;;  %s484_s10 = int_to_ptr.hbm [resolvable:$true] %s483_s10 }
  0x69   : > { %2292 = dma.hbm_to_vmem [thread:$0]  (!%p2290_p12), %s454_s8, 16, %s456_s20, [#allocation15]  }
  0x6a   : > { %s474_s2 = scalar_lea.sflag [#allocation4], %s2805_s26  ;;  %s2513_s22 = sshra.s32 %s484_s10, 4  ;;  %s2514_s22 = int_to_ptr.hbm [resolvable:$true] %s2513_s22 }
  0x6b   : > { %s2515_s18 = scalar_lea.hbm %s2514_s22, 8  ;;  %s2520_s0 = scalar_lea.hbm %s3273_s4, 16 }
  0x6c   : > { %p2516_p13 = scmp.ne.s32.totalorder %s2514_s22, %s2515_s18  ;;  %p2521_p3 = scmp.lt.s32.totalorder %s2514_s22, %s3273_s4 }
  0x6d   : > { %p2522_p4 = scmp.lt.s32.totalorder %s2520_s0, %s2515_s18 }
  0x6e   : > { %p2518_p0 = pnand %p2516_p13, %p2822_p7 }
  0x6f   : > { %p2523_p6 = por %p2522_p4, %p2521_p3 }
  0x70   : > { %p2519_p1 = pneg %p2518_p0 }
  0x72   : > { %p2524_p11 = pnand %p2523_p6, %p2519_p1 }
  0x74   : > { %2527 = shalt.err (!%p2524_p11)
}
  0x75   : > { %2296 = dma.hbm_to_vmem [thread:$0]  (!%p2810_p5), %s484_s10, 128, %s486_s16, %s474_s2  }
  0x76   : > { %s521_s6 = scalar_lea.hbm %s3276_s7, %s2683_s21  ;;  %s518_s11 = scalar_lea.vmem [#allocation7], %s2805_s26 }
  0x77   : > { %s525_s14 = sshll.u32 %s518_s11, 4  ;;  %s523_s24 = sshll.u32 %s521_s6, 4  ;;  %s526_s14 = int_to_ptr.vmem [resolvable:$true] %s525_s14  ;;  %s524_s24 = int_to_ptr.hbm [resolvable:$true] %s523_s24 }
  0x78   : > { %s2543_s5 = sshra.s32 %s524_s24, 4  ;;  %s2550_s16 = scalar_lea.hbm %s3276_s7, 2  ;;  %s2544_s5 = int_to_ptr.hbm [resolvable:$true] %s2543_s5 }
  0x79   : > { %s2545_s22 = scalar_lea.hbm %s2544_s5, 1  ;;  %p2551_p1 = scmp.lt.s32.totalorder %s2544_s5, %s3276_s7 }
  0x7a   : > { %p2546_p12 = scmp.ne.s32.totalorder %s2544_s5, %s2545_s22  ;;  %p2552_p3 = scmp.lt.s32.totalorder %s2550_s16, %s2545_s22 }
  0x7c   : > { %p2548_p13 = pnand %p2546_p12, %p2822_p7  ;;  %p2553_p4 = por %p2552_p3, %p2551_p1 }
  0x7e   : > { %p2549_p0 = pneg %p2548_p13 }
  0x80   : > { %p2554_p6 = pnand %p2553_p4, %p2549_p0 }
  0x82   : > { %2557 = shalt.err (!%p2554_p6)
}
  0x83   : > { %s3315_s18 = scalar_lea.sflag [#allocation6], %s2808_s27  ;;  %s2573_s0 = sshra.s32 %s2861_s23, 4  ;;  %s2574_s0 = int_to_ptr.hbm [resolvable:$true] %s2573_s0 }
  0x84   : > { %2302 = dma.hbm_to_vmem [thread:$0]  (!%p2810_p5), %s524_s24, 16, %s526_s14, %s3315_s18  }
  0x85   : > { %s2575_s13 = scalar_lea.hbm %s2574_s0, 256  ;;  %s2580_s6 = scalar_lea.hbm %s3278_s9, 512 }
  0x86   : > { %p2576_p11 = scmp.ne.s32.totalorder %s2574_s0, %s2575_s13  ;;  %p2581_p0 = scmp.lt.s32.totalorder %s2574_s0, %s3278_s9 }
  0x87   : > { %p2582_p1 = scmp.lt.s32.totalorder %s2580_s6, %s2575_s13 }
  0x88   : > { %p2578_p12 = pnand %p2576_p11, %p2822_p7 }
  0x89   : > { %p2583_p3 = por %p2582_p1, %p2581_p0 }
  0x8a   : > { %p2579_p13 = pneg %p2578_p12 }
  0x8c   : > { %p2584_p4 = pnand %p2583_p3, %p2579_p13 }
  0x8e   : > { %2587 = shalt.err (!%p2584_p4)
}
  0x8f   : > { %s2688_s14 = smov 256   ;;  %s2689_s24 = smov 16  }
  0x90   : > { %s3316_s22 = scalar_lea.sflag [#allocation9], %s2808_s27  ;;  %s606_s16 = scalar_lea.hbm %s3281_s12, %s2683_s21 }
  0x91   : > { %2308 = dma.hbm_to_vmem [thread:$0]  (!%p2810_p5), %s2861_s23, 4096, %s2863_s17, %s3316_s22, %s2688_s14, %s2688_s14, %s2689_s24  }
  0x92   : > { %s603_s10 = scalar_lea.vmem [#allocation13], %s2805_s26  ;;  %s608_s18 = sshll.u32 %s606_s16, 4  ;;  %s609_s18 = int_to_ptr.hbm [resolvable:$true] %s608_s18 }
  0x93   : > { %s610_s2 = sshll.u32 %s603_s10, 4  ;;  %s2603_s0 = sshra.s32 %s609_s18, 4  ;;  %s611_s2 = int_to_ptr.vmem [resolvable:$true] %s610_s2  ;;  %s2604_s0 = int_to_ptr.hbm [resolvable:$true] %s2603_s0 }
  0x94   : > { %s2605_s13 = scalar_lea.hbm %s2604_s0, 1  ;;  %s2610_s23 = scalar_lea.hbm %s3281_s12, 2 }
  0x95   : > { %p2606_p6 = scmp.ne.s32.totalorder %s2604_s0, %s2605_s13  ;;  %p2611_p13 = scmp.lt.s32.totalorder %s2604_s0, %s3281_s12 }
  0x96   : > { %p2612_p0 = scmp.lt.s32.totalorder %s2610_s23, %s2605_s13 }
  0x97   : > { %p2608_p11 = pnand %p2606_p6, %p2822_p7 }
  0x98   : > { %p2613_p1 = por %p2612_p0, %p2611_p13 }
  0x99   : > { %p2609_p12 = pneg %p2608_p11 }
  0x9b   : > { %p2614_p3 = pnand %p2613_p1, %p2609_p12 }
  0x9d   : > { %2617 = shalt.err (!%p2614_p3)
}
  0x9e   : > { %s3317_s21 = scalar_lea.sflag [#allocation12], %s2808_s27  ;;  %619 = sbr.rel (%p2899_p10) target bundleno = 1616 (0x650), region = 80 }
  0x9f   : > { %2314 = dma.hbm_to_vmem [thread:$0]  (!%p2810_p5), %s609_s18, 16, %s611_s2, %s3317_s21  }
  0xa0   : > { %s2975_s15 = sand.u32 (!%p2899_p10), 1, %s2675_s19  }
  0xa1   : > { %s1925_s26 = sshll.u32 (!%p2899_p10), %s2975_s15, 3  ;;  %s622_s11 = scalar_lea.sflag (!%p2899_p10), [#allocation4], %s2975_s15 }
  0xa2   : > { %s2979_s5 = scalar_lea.vmem (!%p2899_p10), [#allocation3], %s1925_s26 }
  0xa3   : > { %2650 = dma.done.wait (%p2892_p9), %s622_s11, 128  }
  0xa4   : > { %2652 = vsyncadd (%p2892_p9), %s622_s11, 4294967168  ;;  %s631_s27 = sand.u32 1, %s2882_s30   ;;  %s634_s1 = scalar_lea.vmem [#allocation5], %s2975_s15 }
  0xa5   : > { %s632_s28 = scalar_lea.sflag [#allocation6], %s631_s27 }
  0xa6   : > { %2654 = dma.done.wait (%p2892_p9), %s632_s28, 32  }
  0xa7   : > { %2656 = vsyncadd (%p2892_p9), %s632_s28, 4294967264  ;;  %s643_s14 = scalar_lea.vmem [#allocation7], %s2975_s15  ;;  %s650_s24 = scalar_lea.sflag [#allocation9], %s631_s27 }
  0xa8   : > { %s652_s22 = scalar_lea.vmem [#allocation8], %s2975_s15 }
  0xa9   : > { %2658 = dma.done.wait (%p2892_p9), %s650_s24, 4112  }
  0xaa   : > { %2660 = vsyncadd (%p2892_p9), %s650_s24, 4294963184  ;;  %s1926_s25 = sshll.u32 %s2975_s15, 8  ;;  %s669_s16 = scalar_lea.sflag [#allocation12], %s631_s27 }
  0xab   : > { %s2998_s29 = scalar_lea.vmem [#allocation10], %s1926_s25  ;;  %s3000_s10 = scalar_lea.vmem [#allocation11], %s1926_s25 }
  0xac   : > { %2662 = dma.done.wait (%p2892_p9), %s669_s16, 4112  }
  0xad   : > { %2664 = vsyncadd (%p2892_p9), %s669_s16, 4294963184 }
  0xae   : > { %2666 = dma.done.wait (%p148_p2), [#allocation15], 16  }
  0xaf   : > { %2668 = vsyncadd (%p148_p2), [#allocation15], 4294967280  ;;  %p766_p5 = scmp.lt.s32.totalorder %s2882_s30, 1  ;;  %s3318_s8 = sld [smem:[#allocation28_spill]] }
  0xb0   : > { %s3319_s6 = sld [smem:[#allocation27_spill]] }
  0xb1   : > { %s3013_s18 = scalar_select %p766_p5, %s2882_s30, 1 }
  0xb2   : > { %s3320_s28 = sld [smem:[#allocation31_spill]] }
  0xb3   : > { %s1929_s0 = sshll.u32 %s3013_s18, 3  ;;  %s1930_s26 = sshll.u32 %s3013_s18, 2 }
  0xb4   : > { %781 = sbr.rel (%p1914_p8) target bundleno = 189 (0xbd), region = 116  ;;  %s3321_s2 = sld [smem:[#allocation24_spill]] (!%p1914_p8) }
  0xb5   : > { %s772_s20 = scalar_lea.vmem %s3318_s8, %s3013_s18 }
  0xb6   : > { %s3023_s21 = scalar_lea.vmem %s3319_s6, %s1929_s0 }
  0xb8   : > { %s3029_s24 = scalar_lea.vmem %s3320_s28, %s1930_s26 }
  0xba   : > { %v782_v0 = vld [vmem:[%s3321_s2] sm:$0xff]  ;;  %v783_v1 = vld [vmem:[%s3321_s2 + $0x8] sm:$0xff] }
  0xbb   : > { %784 = vst [vmem:[#allocation2] sm:$0xff] %v782_v0 }
  0xbc   : > { %785 = vst [vmem:[#allocation2 + $0x8] sm:$0xff] %v783_v1 }
  0xbd PF: > { %v2690_v4 = vmov 128.0   ;;  %v2356_v33 = vld [vmem:[%s772_s20] ss:$0 sm:$0xff]  ;;  %vm839_vm6 = vcmask 1043456   ;;  %s3323_s17 = sld [smem:[#allocation25_spill]]  ;;  %vm835_vm8 = vcmask 64512  }
  0xbe   : > { %2361 = vrcp.f32 %v2690_v4  ;;  %v2357_v36 = vld [vmem:[%s634_s1] ss:$0 sm:$0xff]  ;;  %v790_v55 = vld [vmem:[%s2979_s5] sm:$0xff]  ;;  %s3324_s5 = sld [smem:[#allocation26_spill]]  ;;  %vm864_vm9 = vcmask 130048   ;;  %p2196_p7 = scmp.ne.s32.totalorder %s2882_s30, 1 }
  0xbf   : > { %v789_v54 = vld [vmem:[%s3023_s21] sm:$0xff]  ;;  %s3327_s21 = sld [smem:[#allocation35_spill]] (!%p2196_p7) }
  0xc2   : > { %v3042_v3 = vld [vmem:[#allocation2] sm:$0xff] }
  0xc3   : > { %v3039_v2 = vld [vmem:[#allocation2 + $0x8] sm:$0xff]  ;;  %v2201_v46 = vld [vmem:[%s3323_s17] sm:$0xff] }
  0xc4   : > { %884 = vadd.xlane.f32.xlu0 %v3039_v2  ;;  %v2362_v5 = vpop.eup %2361 }
  0xc5   : > { %v797_v6 = vmul.f32 128.0, %v2362_v5  ;;  %vm801_vm0 = vweird.f32 %v2362_v5 }
  0xc7   : > { %v798_v7 = vsub.f32 1.0, %v797_v6 }
  0xc9   : > { %v799_v8 = vmul.f32 %v2362_v5, %v798_v7 }
  0xcb   : > { %v800_v9 = vadd.f32 %v2362_v5, %v799_v8 }
  0xcc   : > { %794 = vadd.xlane.f32.xlu0 %v3042_v3 }
  0xcd   : > { %v3045_v10 = vsel %vm801_vm0, %v2362_v5, %v800_v9 }
 0x137   : > { %v885_v11 = vpop.xlane.xlu0 %884 }
 0x138   : > { %v886_v12 = vmul.f32 %v885_v11, %v3045_v10  ;;  %v788_v11 = vld [vmem:[%s3324_s5] sm:$0xf] }
 0x13a   : > { %v887_v13 = vsub.f32 %v3039_v2, %v886_v12 }
 0x13c   : > { %v888_v14 = vmul.f32 %v887_v13, %v887_v13 }
 0x13e   : > { %889 = vadd.xlane.f32.xlu1 %v888_v14 }
 0x13f   : > { %v795_v15 = vpop.xlane.xlu0 %794 }
 0x140   : > { %v803_v16 = vmul.f32 %v3045_v10, %v795_v15 }
 0x142   : > { %v804_v17 = vsub.f32 %v3042_v3, %v803_v16 }
 0x144   : > { %v805_v18 = vmul.f32 %v804_v17, %v804_v17 }
 0x146   : > { %806 = vadd.xlane.f32.xlu1 %v805_v18 }
 0x1b1   : > { %v890_v19 = vpop.xlane.xlu1 %889 }
 0x1b2   : > { %v891_v20 = vmul.f32 %v890_v19, %v3045_v10 }
 0x1b4   : > { %v892_v21 = vadd.f32 1e-05, %v891_v20 }
 0x1b6   : > { %2363 = vrsqrt.f32 %v892_v21  ;;  %vm899_vm2 = vweird.f32 %v892_v21 }
 0x1b9   : > { %v807_v22 = vpop.xlane.xlu1 %806 }
 0x1ba   : > { %v808_v23 = vmul.f32 %v807_v22, %v3045_v10 }
 0x1bc   : > { %v2364_v24 = vpop.eup %2363  ;;  %v809_v25 = vadd.f32 1e-05, %v808_v23 }
 0x1bd   : > { %v894_v26 = vmul.f32 %v2364_v24, %v892_v21  ;;  %vm900_vm1 = vweird.f32 %v2364_v24 }
 0x1be   : > { %2365 = vrsqrt.f32 %v809_v25  ;;  %vm901_vm3 = vmor %vm899_vm2, %vm900_vm1  ;;  %vm816_vm5 = vweird.f32 %v809_v25 }
 0x1bf   : > { %v895_v27 = vmul.f32 %v2364_v24, %v894_v26  ;;  %v2230_v26 = vld [vmem:[%s2998_s29 + $0xe4] sm:$0xf] }
 0x1c1   : > { %v896_v28 = vmul.f32 0.5, %v895_v27 }
 0x1c3   : > { %v897_v29 = vsub.f32 1.5, %v896_v28  ;;  %v2056_v28 = vld [vmem:[%s2998_s29 + $0xf0] sm:$0xf0] }
 0x1c4   : > { %v2366_v30 = vpop.eup %2365 }
 0x1c5   : > { %v898_v31 = vmul.f32 %v2364_v24, %v897_v29  ;;  %v811_v32 = vmul.f32 %v2366_v30, %v809_v25  ;;  %vm817_vm4 = vweird.f32 %v2366_v30  ;;  %v2232_v25 = vld [vmem:[%s2998_s29 + $0xec] sm:$0xf0]  ;;  %v2062_v29 = vld [vmem:[%s2998_s29 + $0xe8] sm:$0xf] }
 0x1c6   : > { %vm818_vm7 = vmor %vm816_vm5, %vm817_vm4 }
 0x1c7   : > { %v812_v34 = vmul.f32 %v2366_v30, %v811_v32  ;;  %v902_v35 = vsel %vm901_vm3, %v2364_v24, %v898_v31  ;;  %v2054_v24 = vld [vmem:[%s2998_s29 + $0xe0] sm:$0xf]  ;;  %v2059_v31 = vor.u32 %v2230_v26, %v2056_v28  ;;  %v2212_v26 = vld [vmem:[%s2998_s29 + $0x4c] sm:$0xf0] }
 0x1c8   : > { %v903_v37 = vmul.f32 %v902_v35, %v887_v13  ;;  %v2055_v27 = vor.u32 %v2232_v25, %v2054_v24  ;;  %v1974_v25 = vld [vmem:[%s2998_s29 + $0x40] sm:$0xf] }
 0x1c9   : > { %v813_v38 = vmul.f32 0.5, %v812_v34  ;;  %v2064_v34 = vld [vmem:[%s2998_s29 + $0xf8] sm:$0xf0]  ;;  %v1975_v28 = vor.u32 %v2212_v26, %v1974_v25  ;;  %v2359_v26 = vld [vmem:[%s652_s22] ss:$0 sm:$0xff]  ;;  %s3326_s22 = sld [smem:[#allocation33_spill]] (!%p2196_p7) }
 0x1ca   : > { %v904_v39 = vmul.f32 %v2356_v33, %v903_v37  ;;  %v2228_v37 = vld [vmem:[%s2998_s29 + $0xcc] sm:$0xf0] }
 0x1cb   : > { %v814_v40 = vsub.f32 1.5, %v813_v38  ;;  %v2226_v38 = vld [vmem:[%s2998_s29 + $0xc4] sm:$0xf] }
 0x1cc   : > { %v905_v41 = vadd.f32 %v2357_v36, %v904_v39 }
 0x1cd   : > { %v815_v42 = vmul.f32 %v2366_v30, %v814_v40  ;;  %v2040_v40 = vld [vmem:[%s2998_s29 + $0xd0] sm:$0xf0] }
 0x1ce   : > { %v906_v43 = vpack.c.bf16 %v905_v41, %v905_v41  ;;  %v2046_v41 = vld [vmem:[%s2998_s29 + $0xc8] sm:$0xf] }
 0x1cf   : > { %v819_v44 = vsel %vm818_vm7, %v2366_v30, %v815_v42  ;;  %v2233_v30 = vld [vmem:[%s2998_s29 + $0xf4] sm:$0xf0] }
 0x1d0   : > { %v908_v45 = vsel %vm839_vm6, %v906_v43, 0  ;;  %v820_v47 = vmul.f32 %v819_v44, %v804_v17  ;;  %v2063_v32 = vor.u32 %v2233_v30, %v2062_v29  ;;  %v2229_v42 = vld [vmem:[%s2998_s29 + $0xd4] sm:$0xf0]  ;;  %v2043_v43 = vor.u32 %v2226_v38, %v2040_v40  ;;  %v1976_v29 = vld [vmem:[%s2998_s29 + $0x50] sm:$0xf0] }
 0x1d1   : > { %917 = vmatpush.bf16.msra.mxu2 %v908_v45  ;;  %v2047_v44 = vor.u32 %v2229_v42, %v2046_v41  ;;  %v2227_v45 = vld [vmem:[%s2998_s29 + $0xcc] sm:$0xf]  ;;  %v1982_v30 = vld [vmem:[%s2998_s29 + $0x48] sm:$0xf]  ;;  %v2208_v38 = vld [vmem:[%s2998_s29 + $0x2c] sm:$0xf0] }
 0x1d2   : > { %v824_v48 = vmul.f32 %v2356_v33, %v820_v47  ;;  %v2231_v33 = vld [vmem:[%s2998_s29 + $0xec] sm:$0xf]  ;;  %v1960_v41 = vld [vmem:[%s2998_s29 + $0x30] sm:$0xf0]  ;;  %v1966_v42 = vld [vmem:[%s2998_s29 + $0x28] sm:$0xf] }
 0x1d3   : > { %v2067_v35 = vor.u32 %v2231_v33, %v2064_v34  ;;  %v2211_v34 = vld [vmem:[%s2998_s29 + $0x4c] sm:$0xf] }
 0x1d4   : > { %1938 = vmatmul.msk.bf16.vlgmr.msra.gmra.mxu2 %vm835_vm8, %v2201_v46  ;;  %v828_v49 = vadd.f32 %v2357_v36, %v824_v48  ;;  %v2038_v36 = vld [vmem:[%s2998_s29 + $0xc0] sm:$0xf] }
 0x1d5   : > { %1231 = vmatpush.bf16.msrb.mxu2 %v2063_v32  ;;  %v2039_v39 = vor.u32 %v2228_v37, %v2038_v36  ;;  %v2022_v48 = vld [vmem:[%s2998_s29 + $0xa0] sm:$0xf] }
 0x1d6   : > { %v829_v50 = vpack.c.bf16 %v828_v49, %v828_v49  ;;  %v2224_v49 = vld [vmem:[%s2998_s29 + $0xac] sm:$0xf0]  ;;  %v1958_v37 = vld [vmem:[%s2998_s29 + $0x20] sm:$0xf] }
 0x1d7   : > { %v1959_v40 = vor.u32 %v2208_v38, %v1958_v37  ;;  %v2256_v37 = vld [vmem:[%s3000_s10 + $0xb0] sm:$0xff] }
 0x1d8   : > { %v841_v51 = vsel %vm839_vm6, %v829_v50, 0  ;;  %v2222_v50 = vld [vmem:[%s2998_s29 + $0xa4] sm:$0xf]  ;;  %v2264_v38 = vld [vmem:[%s3000_s10 + $0xf0] sm:$0xff] }
 0x1d9   : > { %850 = vmatpush.bf16.msra.mxu0 %v841_v51  ;;  %1232 = vmatpush.bf16.msrb.mxu2 %v2047_v44  ;;  %v2023_v51 = vor.u32 %v2224_v49, %v2022_v48  ;;  %v1942_v48 = vld [vmem:[%s2998_s29] sm:$0xf] }
 0x1dc   : > { %1936 = vmatmul.msk.bf16.vlgmr.msra.gmra.mxu0 %vm835_vm8, %v2201_v46  ;;  %v2048_v46 = vld [vmem:[%s2998_s29 + $0xd8] sm:$0xf0] }
 0x1dd   : > { %1203 = vmatpush.bf16.msrb.mxu0 %v2055_v27  ;;  %v2051_v47 = vor.u32 %v2227_v45, %v2048_v46  ;;  %v2210_v27 = vld [vmem:[%s2998_s29 + $0x44] sm:$0xf]  ;;  %v2207_v46 = vld [vmem:[%s2998_s29 + $0x2c] sm:$0xf] }
 0x1de   : > { %v1979_v32 = vor.u32 %v2210_v27, %v1976_v29 }
 0x1e1   : > { %1204 = vmatpush.bf16.msrb.mxu0 %v2039_v39  ;;  %v2206_v39 = vld [vmem:[%s2998_s29 + $0x24] sm:$0xf] }
 0x1e2   : > { %v1963_v44 = vor.u32 %v2206_v39, %v1960_v41  ;;  %v2238_v39 = vld [vmem:[%s3000_s10 + $0x20] sm:$0xff]  ;;  %v2255_v41 = vld [vmem:[%s3000_s10 + $0xa8] sm:$0xff] }
 0x1e5   : > { %1205 = vmatpush.bf16.msrb.mxu0 %v2023_v51  ;;  %v2204_v51 = vld [vmem:[%s2998_s29 + $0xc] sm:$0xf0] }
 0x257   : > { %v919_v52 = vpop.f32.mrf.mxu2 }
 0x258   : > { %v924_v57 = vmul.f32 %v919_v52, %v789_v54  ;;  %v928_v58 = vmul.f32 %v919_v52, %v790_v55  ;;  %v2024_v52 = vld [vmem:[%s2998_s29 + $0xb0] sm:$0xf0] }
 0x259   : > { %v852_v53 = vpop.f32.mrf.mxu0 }
 0x25a   : > { %v857_v61 = vmul.f32 %v852_v53, %v789_v54  ;;  %v861_v62 = vmul.f32 %v852_v53, %v790_v55  ;;  %v2030_v53 = vld [vmem:[%s2998_s29 + $0xa8] sm:$0xf] }
 0x25f   : > { %v921_v56 = vpop.f32.mrf.mxu2 }
 0x260   : > { %v925_v59 = vmul.f32 %v921_v56, %v790_v55  ;;  %v927_v60 = vmul.f32 %v921_v56, %v789_v54 }
 0x261   : > { %v854_v63 = vpop.f32.mrf.mxu0 }
 0x262   : > { %v858_v0 = vmul.f32 %v854_v63, %v790_v55  ;;  %v860_v1 = vmul.f32 %v854_v63, %v789_v54  ;;  %v926_v4 = vsub.f32 %v924_v57, %v925_v59  ;;  %v929_v5 = vadd.f32 %v928_v58, %v927_v60  ;;  %v2225_v54 = vld [vmem:[%s2998_s29 + $0xb4] sm:$0xf0]  ;;  %v2223_v57 = vld [vmem:[%s2998_s29 + $0xac] sm:$0xf]  ;;  %v2032_v58 = vld [vmem:[%s2998_s29 + $0xb8] sm:$0xf0] }
 0x263   : > { %v2027_v55 = vor.u32 %v2222_v50, %v2024_v52  ;;  %v2031_v56 = vor.u32 %v2225_v54, %v2030_v53  ;;  %v2035_v59 = vor.u32 %v2223_v57, %v2032_v58  ;;  %v2006_v60 = vld [vmem:[%s2998_s29 + $0x80] sm:$0xf]  ;;  %v2202_v52 = vld [vmem:[%s2998_s29 + $0x4] sm:$0xf]  ;;  %v1944_v53 = vld [vmem:[%s2998_s29 + $0x10] sm:$0xf0] }
 0x264   : > { %v930_v6 = vpack.c.bf16 %v929_v5, %v926_v4  ;;  %v859_v7 = vsub.f32 %v857_v61, %v858_v0  ;;  %v862_v8 = vadd.f32 %v861_v62, %v860_v1  ;;  %v2220_v61 = vld [vmem:[%s2998_s29 + $0x8c] sm:$0xf0]  ;;  %v2218_v62 = vld [vmem:[%s2998_s29 + $0x84] sm:$0xf]  ;;  %v2008_v0 = vld [vmem:[%s2998_s29 + $0x90] sm:$0xf0] }
 0x265   : > { %1233 = vmatpush.bf16.msrb.mxu2 %v2031_v56  ;;  %v2007_v63 = vor.u32 %v2220_v61, %v2006_v60  ;;  %v2014_v1 = vld [vmem:[%s2998_s29 + $0x88] sm:$0xf]  ;;  %v2221_v4 = vld [vmem:[%s2998_s29 + $0x94] sm:$0xf0]  ;;  %v2011_v5 = vor.u32 %v2218_v62, %v2008_v0  ;;  %v1947_v56 = vor.u32 %v2202_v52, %v1944_v53  ;;  %v1952_v61 = vld [vmem:[%s2998_s29 + $0x18] sm:$0xf0] }
 0x266   : > { %938 = vmatpush.bf16.msra.mxu3 %v930_v6  ;;  %v863_v9 = vpack.c.bf16 %v862_v8, %v859_v7  ;;  %v2015_v6 = vor.u32 %v2221_v4, %v2014_v1  ;;  %v2219_v7 = vld [vmem:[%s2998_s29 + $0x8c] sm:$0xf]  ;;  %v2016_v8 = vld [vmem:[%s2998_s29 + $0x98] sm:$0xf0]  ;;  %v1950_v57 = vld [vmem:[%s2998_s29 + $0x8] sm:$0xf] }
 0x267   : > { %1206 = vmatpush.bf16.msrb.mxu0 %v2007_v63  ;;  %v2205_v58 = vld [vmem:[%s2998_s29 + $0x14] sm:$0xf0] }
 0x268   : > { %875 = vmatpush.bf16.msra.mxu1 %v863_v9  ;;  %v2019_v9 = vor.u32 %v2219_v7, %v2016_v8  ;;  %v1951_v60 = vor.u32 %v2205_v58, %v1950_v57  ;;  %v2260_v57 = vld [vmem:[%s3000_s10 + $0xd0] sm:$0xff] }
 0x269   : > { %1939 = vmatmul.msk.bf16.vlgmr.msra.gmra.mxu3 %vm864_vm9, %v788_v11  ;;  %1234 = vmatpush.bf16.msrb.mxu2 %v2015_v6 }
 0x26a   : > { %1245 = vmatpush.bf16.msrb.mxu3 %v2067_v35  ;;  %v1984_v35 = vld [vmem:[%s2998_s29 + $0x58] sm:$0xf0] }
 0x26b   : > { %1937 = vmatmul.msk.bf16.vlgmr.msra.gmra.mxu1 %vm864_vm9, %v788_v11  ;;  %v1990_v11 = vld [vmem:[%s2998_s29 + $0x60] sm:$0xf]  ;;  %v1987_v36 = vor.u32 %v2211_v34, %v1984_v35  ;;  %v2265_v34 = vld [vmem:[%s3000_s10 + $0xf8] sm:$0xff]  ;;  %v2239_v35 = vld [vmem:[%s3000_s10 + $0x28] sm:$0xff] }
 0x26c   : > { %1217 = vmatpush.bf16.msrb.mxu1 %v2059_v31  ;;  %v2213_v31 = vld [vmem:[%s2998_s29 + $0x54] sm:$0xf0] }
 0x26d   : > { %v1983_v33 = vor.u32 %v2213_v31, %v1982_v30  ;;  %v2241_v30 = vld [vmem:[%s3000_s10 + $0x38] sm:$0xff] }
 0x26e   : > { %1246 = vmatpush.bf16.msrb.mxu3 %v2051_v47  ;;  %v1968_v47 = vld [vmem:[%s2998_s29 + $0x38] sm:$0xf0] }
 0x26f   : > { %v1971_v50 = vor.u32 %v2207_v46, %v1968_v47  ;;  %v2249_v31 = vld [vmem:[%s3000_s10 + $0x78] sm:$0xff]  ;;  %v2262_v46 = vld [vmem:[%s3000_s10 + $0xe0] sm:$0xff]  ;;  %v2236_v47 = vld [vmem:[%s3000_s10 + $0x10] sm:$0xff] }
 0x270   : > { %1218 = vmatpush.bf16.msrb.mxu1 %v2043_v43  ;;  %v2209_v43 = vld [vmem:[%s2998_s29 + $0x34] sm:$0xf0] }
 0x271   : > { %v1967_v45 = vor.u32 %v2209_v43, %v1966_v42  ;;  %v2263_v42 = vld [vmem:[%s3000_s10 + $0xe8] sm:$0xff]  ;;  %v2237_v43 = vld [vmem:[%s3000_s10 + $0x18] sm:$0xff] }
 0x272   : > { %1247 = vmatpush.bf16.msrb.mxu3 %v2035_v59  ;;  %v2203_v59 = vld [vmem:[%s2998_s29 + $0xc] sm:$0xf] }
 0x273   : > { %v1955_v63 = vor.u32 %v2203_v59, %v1952_v61 }
 0x274   : > { %1219 = vmatpush.bf16.msrb.mxu1 %v2027_v55  ;;  %v1943_v55 = vor.u32 %v2204_v51, %v1942_v48  ;;  %v2244_v48 = vld [vmem:[%s3000_s10 + $0x50] sm:$0xff]  ;;  %v2261_v51 = vld [vmem:[%s3000_s10 + $0xd8] sm:$0xff] }
 0x276   : > { %1248 = vmatpush.bf16.msrb.mxu3 %v2019_v9 }
 0x278   : > { %1220 = vmatpush.bf16.msrb.mxu1 %v2011_v5 }
 0x2e8   : > { %v877_v12 = vpop.f32.mrf.mxu1 }
 0x2e9   : > { %v3069_v13 = vadd.f32 %v877_v12, %v3042_v3  ;;  %v2216_v12 = vld [vmem:[%s2998_s29 + $0x6c] sm:$0xf0] }
 0x2eb   : > { %950 = vadd.xlane.f32.xlu2 %v3069_v13 }
 0x2ec   : > { %v940_v14 = vpop.f32.mrf.mxu3 }
 0x2ed   : > { %v3073_v15 = vadd.f32 %v940_v14, %v3039_v2  ;;  %v2214_v14 = vld [vmem:[%s2998_s29 + $0x64] sm:$0xf] }
 0x2f0   : > { %v879_v16 = vpop.f32.mrf.mxu1 }
 0x2f1   : > { %v1991_v16 = vor.u32 %v2216_v12, %v1990_v11 }
 0x2f3   : > { %952 = vadd.xlane.f32.xlu2 %v3073_v15  ;;  %1207 = vmatpush.bf16.msrb.mxu0 %v1991_v16 }
 0x2f4   : > { %v942_v17 = vpop.f32.mrf.mxu3 }
 0x2f5   : > { %v1992_v17 = vld [vmem:[%s2998_s29 + $0x70] sm:$0xf0] }
 0x2f7   : > { %1208 = vmatpush.bf16.msrb.mxu0 %v1975_v28 }
 0x2fb   : > { %1209 = vmatpush.bf16.msrb.mxu0 %v1959_v40  ;;  %v2246_v40 = vld [vmem:[%s3000_s10 + $0x60] sm:$0xff] }
 0x2ff   : > { %1210 = vmatpush.bf16.msrb.mxu0 %v1943_v55  ;;  %v2243_v55 = vld [vmem:[%s3000_s10 + $0x48] sm:$0xff] }
 0x303   : > { %1595 = vmatpush.bf16.msra.mxu0 %v2241_v30 }
 0x35e   : > { %v951_v18 = vpop.xlane.xlu2 %950 }
 0x35f   : > { %v954_v3 = vmul.f32 %v951_v18, %v3045_v10  ;;  %v1998_v18 = vld [vmem:[%s2998_s29 + $0x68] sm:$0xf] }
 0x361   : > { %v3078_v19 = vsub.f32 %v3069_v13, %v954_v3  ;;  %v2217_v3 = vld [vmem:[%s2998_s29 + $0x74] sm:$0xf0] }
 0x363   : > { %v958_v20 = vmul.f32 %v3078_v19, %v3078_v19 }
 0x365   : > { %960 = vadd.xlane.f32.xlu0 %v958_v20  ;;  %v1995_v20 = vor.u32 %v2214_v14, %v1992_v17 }
 0x366   : > { %v953_v2 = vpop.xlane.xlu2 %952 }
 0x367   : > { %v955_v21 = vmul.f32 %v953_v2, %v3045_v10  ;;  %v1999_v2 = vor.u32 %v2217_v3, %v1998_v18  ;;  %1221 = vmatpush.bf16.msrb.mxu1 %v1995_v20 }
 0x369   : > { %v3084_v22 = vsub.f32 %v3073_v15, %v955_v21  ;;  %v2215_v21 = vld [vmem:[%s2998_s29 + $0x6c] sm:$0xf]  ;;  %1235 = vmatpush.bf16.msrb.mxu2 %v1999_v2  ;;  %v2358_v2 = vld [vmem:[%s643_s14] ss:$0 sm:$0xff]  ;;  %s3325_s14 = scalar_lea.vmem [#allocation13], %s2975_s15 }
 0x36b   : > { %v959_v23 = vmul.f32 %v3084_v22, %v3084_v22  ;;  %1222 = vmatpush.bf16.msrb.mxu1 %v1979_v32  ;;  %v2248_v32 = vld [vmem:[%s3000_s10 + $0x70] sm:$0xff] }
 0x36d   : > { %962 = vadd.xlane.f32.xlu1 %v959_v23  ;;  %v2000_v23 = vld [vmem:[%s2998_s29 + $0x78] sm:$0xf0]  ;;  %1236 = vmatpush.bf16.msrb.mxu2 %v1983_v33 }
 0x36e   : > { %v2003_v24 = vor.u32 %v2215_v21, %v2000_v23  ;;  %v2257_v33 = vld [vmem:[%s3000_s10 + $0xb8] sm:$0xff] }
 0x36f   : > { %1223 = vmatpush.bf16.msrb.mxu1 %v1963_v44  ;;  %v2245_v44 = vld [vmem:[%s3000_s10 + $0x58] sm:$0xff] }
 0x370   : > { %1249 = vmatpush.bf16.msrb.mxu3 %v2003_v24 }
 0x371   : > { %1237 = vmatpush.bf16.msrb.mxu2 %v1967_v45  ;;  %v2254_v45 = vld [vmem:[%s3000_s10 + $0xa0] sm:$0xff] }
 0x373   : > { %1224 = vmatpush.bf16.msrb.mxu1 %v1947_v56  ;;  %v2252_v56 = vld [vmem:[%s3000_s10 + $0x90] sm:$0xff] }
 0x374   : > { %1250 = vmatpush.bf16.msrb.mxu3 %v1987_v36  ;;  %v2247_v36 = vld [vmem:[%s3000_s10 + $0x68] sm:$0xff] }
 0x375   : > { %1238 = vmatpush.bf16.msrb.mxu2 %v1951_v60 }
 0x377   : > { %1609 = vmatpush.bf16.msra.mxu1 %v2249_v31 }
 0x378   : > { %1251 = vmatpush.bf16.msrb.mxu3 %v1971_v50  ;;  %v2253_v50 = vld [vmem:[%s3000_s10 + $0x98] sm:$0xff] }
 0x379   : > { %1623 = vmatpush.bf16.msra.mxu2 %v2257_v33 }
 0x37b   : > { %1610 = vmatpush.bf16.msra.mxu1 %v2248_v32 }
 0x37c   : > { %1252 = vmatpush.bf16.msrb.mxu3 %v1955_v63  ;;  %v2242_v63 = vld [vmem:[%s3000_s10 + $0x40] sm:$0xff] }
 0x37d   : > { %1624 = vmatpush.bf16.msra.mxu2 %v2256_v37 }
 0x37f   : > { %1611 = vmatpush.bf16.msra.mxu1 %v2247_v36 }
 0x380   : > { %1637 = vmatpush.bf16.msra.mxu3 %v2265_v34 }
 0x381   : > { %1625 = vmatpush.bf16.msra.mxu2 %v2255_v41 }
 0x383   : > { %1612 = vmatpush.bf16.msra.mxu1 %v2246_v40 }
 0x384   : > { %1638 = vmatpush.bf16.msra.mxu3 %v2264_v38 }
 0x385   : > { %1626 = vmatpush.bf16.msra.mxu2 %v2254_v45 }
 0x387   : > { %1613 = vmatpush.bf16.msra.mxu1 %v2245_v44 }
 0x388   : > { %1639 = vmatpush.bf16.msra.mxu3 %v2263_v42 }
 0x389   : > { %1627 = vmatpush.bf16.msra.mxu2 %v2253_v50 }
 0x38b   : > { %1614 = vmatpush.bf16.msra.mxu1 %v2244_v48 }
 0x38c   : > { %1640 = vmatpush.bf16.msra.mxu3 %v2262_v46 }
 0x38d   : > { %1628 = vmatpush.bf16.msra.mxu2 %v2252_v56 }
 0x38f   : > { %1615 = vmatpush.bf16.msra.mxu1 %v2243_v55 }
 0x390   : > { %1641 = vmatpush.bf16.msra.mxu3 %v2261_v51 }
 0x393   : > { %1616 = vmatpush.bf16.msra.mxu1 %v2242_v63 }
 0x394   : > { %1642 = vmatpush.bf16.msra.mxu3 %v2260_v57 }
 0x3d8   : > { %v961_v49 = vpop.xlane.xlu0 %960 }
 0x3d9   : > { %v964_v54 = vmul.f32 %v961_v49, %v3045_v10  ;;  %v3181_v49 = vld [vmem:[%s3029_s24] sm:$0xf] }
 0x3da   : > { %v1035_v52 = vperm.slane %v3181_v49, 0  ;;  %v1036_v53 = vperm.slane %v3181_v49, 1 }
 0x3db   : > { %v966_v62 = vadd.f32 1e-05, %v964_v54  ;;  %v2235_v54 = vld [vmem:[%s3000_s10 + $0x8] sm:$0xff] }
 0x3dd   : > { %2367 = vrsqrt.f32 %v966_v62  ;;  %vm974_vm11 = vweird.f32 %v966_v62 }
 0x3e0   : > { %v963_v0 = vpop.xlane.xlu1 %962 }
 0x3e1   : > { %v965_v1 = vmul.f32 %v963_v0, %v3045_v10 }
 0x3e3   : > { %v2368_v4 = vpop.eup %2367  ;;  %v967_v5 = vadd.f32 1e-05, %v965_v1 }
 0x3e4   : > { %v969_v6 = vmul.f32 %v2368_v4, %v966_v62  ;;  %vm975_vm10 = vweird.f32 %v2368_v4  ;;  %v2234_v62 = vld [vmem:[%s3000_s10] sm:$0xff] }
 0x3e5   : > { %2369 = vrsqrt.f32 %v967_v5  ;;  %vm976_vm12 = vmor %vm974_vm11, %vm975_vm10  ;;  %vm984_vm14 = vweird.f32 %v967_v5 }
 0x3e6   : > { %v970_v7 = vmul.f32 %v2368_v4, %v969_v6  ;;  %v1037_v6 = vperm.slane %v3181_v49, 2 }
 0x3e8   : > { %v971_v8 = vmul.f32 0.5, %v970_v7  ;;  %v1038_v7 = vperm.slane %v3181_v49, 3 }
 0x3ea   : > { %v972_v9 = vsub.f32 1.5, %v971_v8 }
 0x3eb   : > { %v2370_v11 = vpop.eup %2369 }
 0x3ec   : > { %v973_v12 = vmul.f32 %v2368_v4, %v972_v9  ;;  %v979_v14 = vmul.f32 %v2370_v11, %v967_v5  ;;  %vm985_vm13 = vweird.f32 %v2370_v11  ;;  %v2259_v5 = vld [vmem:[%s3000_s10 + $0xc8] sm:$0xff] }
 0x3ed   : > { %vm986_vm15 = vmor %vm984_vm14, %vm985_vm13  ;;  %1643 = vmatpush.bf16.msra.mxu3 %v2259_v5 }
 0x3ee   : > { %v980_v16 = vmul.f32 %v2370_v11, %v979_v14  ;;  %v977_v17 = vsel %vm976_vm12, %v2368_v4, %v973_v12  ;;  %v2251_v4 = vld [vmem:[%s3000_s10 + $0x88] sm:$0xff] }
 0x3ef   : > { %v988_v20 = vmul.f32 %v977_v17, %v3078_v19  ;;  %1629 = vmatpush.bf16.msra.mxu2 %v2251_v4  ;;  %v2250_v17 = vld [vmem:[%s3000_s10 + $0x80] sm:$0xff] }
 0x3f0   : > { %v981_v18 = vmul.f32 0.5, %v980_v16 }
 0x3f1   : > { %v993_v25 = vmul.f32 %v2358_v2, %v988_v20 }
 0x3f2   : > { %v982_v3 = vsub.f32 1.5, %v981_v18  ;;  %v2258_v18 = vld [vmem:[%s3000_s10 + $0xc0] sm:$0xff] }
 0x3f3   : > { %v998_v28 = vadd.f32 %v2359_v26, %v993_v25  ;;  %1630 = vmatpush.bf16.msra.mxu2 %v2250_v17  ;;  %1644 = vmatpush.bf16.msra.mxu3 %v2258_v18 }
 0x3f4   : > { %v983_v21 = vmul.f32 %v2370_v11, %v982_v3 }
 0x3f6   : > { %v987_v23 = vsel %vm986_vm15, %v2370_v11, %v983_v21 }
 0x3f7   : > { %v989_v24 = vmul.f32 %v987_v23, %v3084_v22  ;;  %v2240_v22 = vld [vmem:[%s3000_s10 + $0x30] sm:$0xff] }
 0x3f8   : > { %1596 = vmatpush.bf16.msra.mxu0 %v2240_v22 }
 0x3f9   : > { %v994_v27 = vmul.f32 %v2358_v2, %v989_v24 }
 0x3fb   : > { %v999_v19 = vadd.f32 %v2359_v26, %v994_v27 }
 0x3fc   : > { %1597 = vmatpush.bf16.msra.mxu0 %v2239_v35 }
 0x3fd   : > { %v1000_v29 = vpack.c.bf16 %v999_v19, %v998_v28 }
 0x3ff   : > { %1211 = vmatmul.bf16.vlgmr.msrb.gmra.mxu0 %v1000_v29  ;;  %1225 = vmatmul.bf16.vlgmr.msrb.gmra.mxu1 %v1000_v29 }
 0x400   : > { %1239 = vmatmul.bf16.vlgmr.msrb.gmra.mxu2 %v1000_v29  ;;  %1253 = vmatmul.bf16.vlgmr.msrb.gmra.mxu3 %v1000_v29 }
 0x401   : > { %1598 = vmatpush.bf16.msra.mxu0 %v2238_v39 }
 0x405   : > { %1599 = vmatpush.bf16.msra.mxu0 %v2237_v43 }
 0x409   : > { %1600 = vmatpush.bf16.msra.mxu0 %v2236_v47 }
 0x40d   : > { %1601 = vmatpush.bf16.msra.mxu0 %v2235_v54 }
 0x411   : > { %1602 = vmatpush.bf16.msra.mxu0 %v2234_v62 }
 0x47c   : > { %v1212_v58 = vpop.f32.mrf.mxu0  ;;  %v1226_v59 = vpop.f32.mrf.mxu1 }
 0x47d   : > { %v3191_v60 = vadd.f32 %v1212_v58, %v1035_v52  ;;  %v3193_v61 = vadd.f32 %v1226_v59, %v1036_v53 }
 0x47f   : > { %v1259_v0 = vmul.f32 %v3191_v60, %v3191_v60  ;;  %v1260_v1 = vmul.f32 %v3193_v61, %v3193_v61 }
 0x481   : > { %v1267_v8 = vmul.f32 %v1259_v0, %v3191_v60  ;;  %v1268_v9 = vmul.f32 %v1260_v1, %v3193_v61 }
 0x483   : > { %v1275_v11 = vmul.f32 0.044715, %v1267_v8  ;;  %v1276_v12 = vmul.f32 0.044715, %v1268_v9  ;;  %v1240_v14 = vpop.f32.mrf.mxu2  ;;  %v1254_v16 = vpop.f32.mrf.mxu3 }
 0x484   : > { %v3209_v3 = vadd.f32 %v1240_v14, %v1037_v6  ;;  %v3211_v20 = vadd.f32 %v1254_v16, %v1038_v7  ;;  %v1214_v2 = vpop.f32.mrf.mxu0  ;;  %v1228_v21 = vpop.f32.mrf.mxu1 }
 0x485   : > { %v1283_v23 = vadd.f32 %v1275_v11, %v3191_v60  ;;  %v1284_v24 = vadd.f32 %v1276_v12, %v3193_v61  ;;  %v3215_v25 = vadd.f32 %v1214_v2, %v1035_v52  ;;  %v3217_v26 = vadd.f32 %v1228_v21, %v1036_v53 }
 0x486   : > { %v1261_v27 = vmul.f32 %v3209_v3, %v3209_v3  ;;  %v1262_v28 = vmul.f32 %v3211_v20, %v3211_v20 }
 0x487   : > { %v1291_v19 = vmul.f32 0.7978846, %v1283_v23  ;;  %v1263_v29 = vmul.f32 %v3215_v25, %v3215_v25  ;;  %v1264_v30 = vmul.f32 %v3217_v26, %v3217_v26  ;;  %v1292_v32 = vmul.f32 0.7978846, %v1284_v24 }
 0x488   : > { %v1269_v31 = vmul.f32 %v1261_v27, %v3209_v3  ;;  %v1270_v22 = vmul.f32 %v1262_v28, %v3211_v20 }
 0x489   : > { %v1271_v33 = vmul.f32 %v1263_v29, %v3215_v25  ;;  %v1272_v34 = vmul.f32 %v1264_v30, %v3217_v26  ;;  %2371 = vtanh.f32 %v1291_v19 }
 0x48a   : > { %v1277_v35 = vmul.f32 0.044715, %v1269_v31  ;;  %v1278_v36 = vmul.f32 0.044715, %v1270_v22  ;;  %2373 = vtanh.f32 %v1292_v32 }
 0x48b   : > { %v1279_v37 = vmul.f32 0.044715, %v1271_v33  ;;  %v1280_v38 = vmul.f32 0.044715, %v1272_v34  ;;  %v1242_v39 = vpop.f32.mrf.mxu2  ;;  %v1256_v40 = vpop.f32.mrf.mxu3 }
 0x48c   : > { %v1285_v41 = vadd.f32 %v1277_v35, %v3209_v3  ;;  %v1286_v42 = vadd.f32 %v1278_v36, %v3211_v20  ;;  %v1243_v43 = vadd.f32 %v1242_v39, %v1037_v6  ;;  %v1257_v44 = vadd.f32 %v1256_v40, %v1038_v7  ;;  %v2360_v39 = vld [vmem:[%s3325_s14] ss:$0 sm:$0xff] }
 0x48d   : > { %v1287_v45 = vadd.f32 %v1279_v37, %v3215_v25  ;;  %v1288_v46 = vadd.f32 %v1280_v38, %v3217_v26 }
 0x48e   : > { %v1293_v47 = vmul.f32 0.7978846, %v1285_v41  ;;  %v1294_v48 = vmul.f32 0.7978846, %v1286_v42  ;;  %v1265_v49 = vmul.f32 %v1243_v43, %v1243_v43  ;;  %v1266_v50 = vmul.f32 %v1257_v44, %v1257_v44 }
 0x48f   : > { %v1295_v51 = vmul.f32 0.7978846, %v1287_v45  ;;  %v1296_v52 = vmul.f32 0.7978846, %v1288_v46  ;;  %v2372_v55 = vpop.eup %2371 }
 0x490   : > { %2375 = vtanh.f32 %v1293_v47  ;;  %v1273_v53 = vmul.f32 %v1265_v49, %v1243_v43  ;;  %v1274_v54 = vmul.f32 %v1266_v50, %v1257_v44  ;;  %v2374_v58 = vpop.eup %2373  ;;  %v1307_v63 = vadd.f32 1.0, %v2372_v55 }
 0x491   : > { %2377 = vtanh.f32 %v1294_v48  ;;  %v1308_v1 = vadd.f32 1.0, %v2374_v58 }
 0x492   : > { %2379 = vtanh.f32 %v1295_v51  ;;  %v1281_v56 = vmul.f32 0.044715, %v1273_v53  ;;  %v1282_v57 = vmul.f32 0.044715, %v1274_v54  ;;  %v1315_v9 = vmul.f32 0.5, %v1307_v63 }
 0x493   : > { %2381 = vtanh.f32 %v1296_v52  ;;  %v1316_v12 = vmul.f32 0.5, %v1308_v1 }
 0x494   : > { %v1289_v59 = vadd.f32 %v1281_v56, %v1243_v43  ;;  %v1290_v62 = vadd.f32 %v1282_v57, %v1257_v44  ;;  %v1323_v21 = vmul.f32 %v1315_v9, %v3191_v60 }
 0x495   : > { %v1324_v27 = vmul.f32 %v1316_v12, %v3193_v61 }
 0x496   : > { %v2376_v0 = vpop.eup %2375  ;;  %v1297_v4 = vmul.f32 0.7978846, %v1289_v59  ;;  %v1298_v5 = vmul.f32 0.7978846, %v1290_v62 }
 0x497   : > { %v2378_v6 = vpop.eup %2377  ;;  %v1309_v16 = vadd.f32 1.0, %v2376_v0 }
 0x498   : > { %v2380_v7 = vpop.eup %2379  ;;  %2383 = vtanh.f32 %v1297_v4  ;;  %v1310_v18 = vadd.f32 1.0, %v2378_v6 }
 0x499   : > { %v2382_v8 = vpop.eup %2381  ;;  %v1311_v11 = vadd.f32 1.0, %v2380_v7  ;;  %2385 = vtanh.f32 %v1298_v5  ;;  %v1317_v29 = vmul.f32 0.5, %v1309_v16 }
 0x49a   : > { %v1312_v14 = vadd.f32 1.0, %v2382_v8  ;;  %v1318_v22 = vmul.f32 0.5, %v1310_v18 }
 0x49b   : > { %v1319_v17 = vmul.f32 0.5, %v1311_v11  ;;  %v1325_v60 = vmul.f32 %v1317_v29, %v3209_v3 }
 0x49c   : > { %v1320_v2 = vmul.f32 0.5, %v1312_v14  ;;  %v1326_v36 = vmul.f32 %v1318_v22, %v3211_v20 }
 0x49d   : > { %v1327_v23 = vmul.f32 %v1319_v17, %v3215_v25 }
 0x49e   : > { %v2384_v24 = vpop.eup %2383  ;;  %v1328_v28 = vmul.f32 %v1320_v2, %v3217_v26 }
 0x49f   : > { %v2386_v19 = vpop.eup %2385  ;;  %v1313_v30 = vadd.f32 1.0, %v2384_v24  ;;  %v1331_v31 = vpack.c.bf16 %v1327_v23, %v1323_v21 }
 0x4a0   : > { %v1314_v32 = vadd.f32 1.0, %v2386_v19  ;;  %v1332_v33 = vpack.c.bf16 %v1328_v28, %v1324_v27 }
 0x4a1   : > { %v1321_v34 = vmul.f32 0.5, %v1313_v30  ;;  %1603 = vmatmul.bf16.vlgmr.msra.gmra.mxu0 %v1331_v31 }
 0x4a2   : > { %v1322_v35 = vmul.f32 0.5, %v1314_v32  ;;  %1617 = vmatmul.bf16.vlgmr.msra.gmra.mxu1 %v1332_v33 }
 0x4a3   : > { %v1329_v25 = vmul.f32 %v1321_v34, %v1243_v43 }
 0x4a4   : > { %v1330_v61 = vmul.f32 %v1322_v35, %v1257_v44 }
 0x4a5   : > { %v1333_v37 = vpack.c.bf16 %v1329_v25, %v1325_v60 }
 0x4a6   : > { %v1334_v26 = vpack.c.bf16 %v1330_v61, %v1326_v36 }
 0x4a7   : > { %1631 = vmatmul.bf16.vlgmr.msra.gmra.mxu2 %v1333_v37 }
 0x4a8   : > { %1645 = vmatmul.bf16.vlgmr.msra.gmra.mxu3 %v1334_v26 }
 0x51e   : > { %v1604_v38 = vpop.f32.mrf.mxu0 }
 0x51f   : > { %v1605_v40 = vadd.f32 %v2360_v39, %v1604_v38  ;;  %v1618_v41 = vpop.f32.mrf.mxu1 }
 0x521   : > { %v1619_v42 = vadd.f32 %v1618_v41, %v1605_v40 }
 0x526   : > { %v1606_v45 = vpop.f32.mrf.mxu0 }
 0x527   : > { %v1607_v49 = vadd.f32 %v2360_v39, %v1606_v45  ;;  %v1620_v20 = vpop.f32.mrf.mxu1 }
 0x529   : > { %v1621_v44 = vadd.f32 %v1620_v20, %v1607_v49 }
 0x52a   : > { %v1632_v46 = vpop.f32.mrf.mxu2 }
 0x52b   : > { %v1633_v47 = vadd.f32 %v1632_v46, %v1619_v42  ;;  %v1646_v48 = vpop.f32.mrf.mxu3 }
 0x52d   : > { %v1647_v3 = vadd.f32 %v1646_v48, %v1633_v47 }
 0x52f   : > { %v1651_v43 = vadd.f32 %v1647_v3, %v3069_v13 }
 0x531   : > { %1653 = vst [vmem:[#allocation2] sm:$0xff] %v1651_v43 }
 0x532   : > { %v1634_v50 = vpop.f32.mrf.mxu2 }
 0x533   : > { %v1635_v51 = vadd.f32 %v1634_v50, %v1621_v44  ;;  %v1648_v52 = vpop.f32.mrf.mxu3 }
 0x535   : > { %v1649_v53 = vadd.f32 %v1648_v52, %v1635_v51  ;;  %1658 = sbr.rel (%p2196_p7) target bundleno = 1616 (0x650), region = 120 }
 0x537   : > { %v1652_v54 = vadd.f32 %v1649_v53, %v3073_v15 }
 0x539   : > { %1654 = vst [vmem:[#allocation2 + $0x8] sm:$0xff] %v1652_v54 }
 0x53a   : > { %v1659_v55 = vld [vmem:[#allocation2] sm:$0xff]  ;;  %v2388_v30 = vld [vmem:[#allocation14] ss:$0 sm:$0xff] }
 0x53b   : > { %1663 = vadd.xlane.f32.xlu0 %v1659_v55 }
 0x540   : > { %v1660_v56 = vld [vmem:[#allocation2 + $0x8] sm:$0xff] }
 0x543   : > { %1665 = vadd.xlane.f32.xlu0 %v1660_v56 }
 0x5ae   : > { %v1664_v57 = vpop.xlane.xlu0 %1663 }
 0x5af   : > { %v1667_v13 = vmul.f32 %v1664_v57, %v3045_v10 }
 0x5b1   : > { %v1669_v58 = vsub.f32 %v1659_v55, %v1667_v13 }
 0x5b3   : > { %v1671_v59 = vmul.f32 %v1669_v58, %v1669_v58 }
 0x5b5   : > { %1673 = vadd.xlane.f32.xlu1 %v1671_v59 }
 0x5b6   : > { %v1666_v62 = vpop.xlane.xlu0 %1665 }
 0x5b7   : > { %v1668_v63 = vmul.f32 %v1666_v62, %v3045_v10 }
 0x5b9   : > { %v1670_v0 = vsub.f32 %v1660_v56, %v1668_v63 }
 0x5bb   : > { %v1672_v1 = vmul.f32 %v1670_v0, %v1670_v0 }
 0x5bd   : > { %1675 = vadd.xlane.f32.xlu1 %v1672_v1 }
 0x628   : > { %v1674_v15 = vpop.xlane.xlu1 %1673 }
 0x629   : > { %v1677_v4 = vmul.f32 %v1674_v15, %v3045_v10 }
 0x62b   : > { %v1679_v5 = vadd.f32 1e-05, %v1677_v4 }
 0x62d   : > { %2389 = vrsqrt.f32 %v1679_v5  ;;  %vm1687_vm1 = vweird.f32 %v1679_v5 }
 0x630   : > { %v1676_v6 = vpop.xlane.xlu1 %1675 }
 0x631   : > { %v1678_v7 = vmul.f32 %v1676_v6, %v3045_v10  ;;  %v2387_v10 = vld [vmem:[%s3326_s22] ss:$0 sm:$0xff] }
 0x633   : > { %v2390_v8 = vpop.eup %2389  ;;  %v1680_v9 = vadd.f32 1e-05, %v1678_v7 }
 0x634   : > { %v1682_v11 = vmul.f32 %v2390_v8, %v1679_v5  ;;  %vm1688_vm0 = vweird.f32 %v2390_v8 }
 0x635   : > { %2391 = vrsqrt.f32 %v1680_v9  ;;  %vm1689_vm2 = vmor %vm1687_vm1, %vm1688_vm0  ;;  %vm1697_vm4 = vweird.f32 %v1680_v9 }
 0x636   : > { %v1683_v12 = vmul.f32 %v2390_v8, %v1682_v11 }
 0x638   : > { %v1684_v14 = vmul.f32 0.5, %v1683_v12 }
 0x63a   : > { %v1685_v16 = vsub.f32 1.5, %v1684_v14 }
 0x63b   : > { %v2392_v17 = vpop.eup %2391 }
 0x63c   : > { %v1686_v18 = vmul.f32 %v2390_v8, %v1685_v16  ;;  %v1692_v2 = vmul.f32 %v2392_v17, %v1680_v9  ;;  %vm1698_vm3 = vweird.f32 %v2392_v17 }
 0x63d   : > { %vm1699_vm5 = vmor %vm1697_vm4, %vm1698_vm3 }
 0x63e   : > { %v1693_v21 = vmul.f32 %v2392_v17, %v1692_v2  ;;  %v1690_v23 = vsel %vm1689_vm2, %v2390_v8, %v1686_v18 }
 0x63f   : > { %v1701_v28 = vmul.f32 %v1690_v23, %v1669_v58 }
 0x640   : > { %v1694_v24 = vmul.f32 0.5, %v1693_v21 }
 0x641   : > { %v1706_v31 = vmul.f32 %v2387_v10, %v1701_v28 }
 0x642   : > { %v1695_v27 = vsub.f32 1.5, %v1694_v24 }
 0x643   : > { %v1711_v33 = vadd.f32 %v2388_v30, %v1706_v31 }
 0x644   : > { %v1696_v19 = vmul.f32 %v2392_v17, %v1695_v27 }
 0x646   : > { %v1700_v29 = vsel %vm1699_vm5, %v2392_v17, %v1696_v19 }
 0x647   : > { %v1702_v22 = vmul.f32 %v1700_v29, %v1670_v0 }
 0x649   : > { %v1707_v32 = vmul.f32 %v2387_v10, %v1702_v22 }
 0x64b   : > { %v1712_v34 = vadd.f32 %v2388_v30, %v1707_v32 }
 0x64d   : > { %v2269_v35 = vpack.c.bf16 %v1712_v34, %v1711_v33 }
 0x64f   : > { %2270 = vst [vmem:[%s3327_s21] sm:$0xff] %v2269_v35  }
 0x650 PF: > { %s3328_s21 = sld [smem:[#allocation22_spill]]  ;;  %s3331_s18 = smov %s2675_s19 }
 0x651   : > { %s3329_s26 = sld [smem:[#allocation21_spill]] }
 0x652   : > { %s3330_s20 = sld [smem:[#allocation23_spill]] }
 0x656   : > { %p35_p2 = scmp.ge.s32.totalorder %s3328_s21, 4  }
 0x657   : > { %s3332_s19 = smov %s3329_s26 }
 0x658   :  { %37 = sbr.rel (!%p35_p2) target bundleno = 23 (0x17), region = 209 }
 0x65d   :  { %1728 = vsyncpa [#allocation4], 1 }
 0x65e   :  { %1730 = vsyncpa [#allocation4 + $0x1], 1 }
 0x65f   :  { %1731 = vsyncpa [#allocation6], 1 }
 0x660   :  { %1733 = vsyncpa [#allocation6 + $0x1], 1 }
 0x661   :  { %1734 = vsyncpa [#allocation9], 1 }
 0x662   :  { %1736 = vsyncpa [#allocation9 + $0x1], 1 }
 0x663   :  { %1737 = vsyncpa [#allocation12], 1 }
 0x664   :  { %1739 = vsyncpa [#allocation12 + $0x1], 1 }
 0x665   :  { %1740 = vsyncpa [#allocation15], 1 }

</bundles_post_ra>
